<compile_context>
chip_gen: v5e
topology: v5e:2x2
jax: 0.10.0
libtpu: 0.0.40
codegen_flags: <defaults>
</compile_context>

<pallas_src>
import functools

import jax
import jax.numpy as jnp
from jax.experimental import pallas as pl
from jax.experimental.pallas import tpu as pltpu

INPUT_SIZE = 13
HIDDEN1 = 1024
HIDDEN2 = 512
OUTPUT_SIZE = 3
OUT_PAD = 128  # lane-dense padded output width (sliced back to 3 outside)


def _round_up(x, m):
    return ((x + m - 1) // m) * m


def _num_tensorcores():
    """2 TensorCores per chip on v7x, 1 on v5e/v6e.  Conservative default: 1."""
    try:
        kind = jax.devices()[0].device_kind.lower()
    except Exception:
        return 1
    return 2 if "v7" in kind else 1


def _choose_grid(batch, block_b, num_cores):
    """Tile derived from the batch (padding waste < 8 rows/step); even number of
    grid steps only on multi-TC parts so 'parallel' sharding stays balanced."""
    block_b = max(8, _round_up(block_b, 8))
    n_steps = max(1, pl.cdiv(batch, block_b))
    if num_cores > 1:
        n_steps = _round_up(max(n_steps, num_cores), num_cores)
    tb = _round_up(pl.cdiv(batch, n_steps), 8)
    return tb, n_steps


def _vmem_limit_bytes(tb):
    """Scoped-VMEM ceiling from actual usage: resident weights (x2 buffers),
    double-buffered x/out tiles, f32+bf16 intermediates, plus headroom.
    Clamped to [32 MiB, 48 MiB] -> always above v5e's 16 MiB default and always
    under v7x's 64 MiB physical VMEM per TensorCore."""
    weights = ((INPUT_SIZE * HIDDEN1 + HIDDEN1 * HIDDEN2 + HIDDEN2 * OUT_PAD) * 2
               + (HIDDEN1 + HIDDEN2 + OUT_PAD) * 4)
    io = 2 * (tb * INPUT_SIZE * 2 + tb * OUT_PAD * 2)
    interm = tb * (HIDDEN1 * (4 + 2) + HIDDEN2 * (4 + 2) + OUT_PAD * 4)
    total = 2 * weights + io + interm + (8 << 20)
    return int(min(max(total, 32 << 20), 48 << 20))


def _mlp_kernel(x_ref, w1_ref, b1_ref, w2_ref, b2_ref, w3_ref, b3_ref, o_ref):
    """Fused 3-layer MLP for one batch tile.

    bf16 matmul operands with f32 MXU accumulation; bias-add + ReLU epilogue in
    f32 (correct on v5e, which has no bf16 VPU path).  Output stored as bf16
    into a 128-lane-wide slab (unmasked lane-dense stores).
    """
    x = x_ref[...]                                                     # bf16 [tb, 13]
    z1 = jnp.dot(x, w1_ref[...], preferred_element_type=jnp.float32)   # f32 [tb, 1024]
    z1 = jnp.maximum(z1 + b1_ref[...], 0.0)
    z2 = jnp.dot(z1.astype(jnp.bfloat16), w2_ref[...],
                 preferred_element_type=jnp.float32)                   # f32 [tb, 512]
    z2 = jnp.maximum(z2 + b2_ref[...], 0.0)
    z3 = jnp.dot(z2.astype(jnp.bfloat16), w3_ref[...],
                 preferred_element_type=jnp.float32)                   # f32 [tb, 128]
    o_ref[...] = (z3 + b3_ref[...]).astype(o_ref.dtype)


def prepare_params(w1, b1, w2, b2, w3, b3):
    """One-time weight prep, hoisted out of the per-call forward path.

    Weights -> bf16 [in, out]; fc3 weight/bias padded to 128 output lanes so the
    kernel's output store is lane-dense.  Biases kept f32, shape [1, out].
    """
    w1b = jnp.asarray(w1, jnp.bfloat16)
    w2b = jnp.asarray(w2, jnp.bfloat16)
    w3b = jnp.pad(jnp.asarray(w3, jnp.float32),
                  ((0, 0), (0, OUT_PAD - OUTPUT_SIZE))).astype(jnp.bfloat16)
    b1f = jnp.asarray(b1, jnp.float32).reshape(1, HIDDEN1)
    b2f = jnp.asarray(b2, jnp.float32).reshape(1, HIDDEN2)
    b3p = jnp.pad(jnp.asarray(b3, jnp.float32).reshape(1, OUTPUT_SIZE),
                  ((0, 0), (0, OUT_PAD - OUTPUT_SIZE)))
    return (w1b, b1f, w2b, b2f, w3b, b3p)


@functools.partial(jax.jit, static_argnames=("tb", "n_steps"))
def _forward_impl(x, w1b, b1, w2b, b2, w3b, b3p, *, tb, n_steps):
    B = x.shape[0]
    B_pad = tb * n_steps

    xb = x.astype(jnp.bfloat16)
    if B_pad != B:
        xb = jnp.pad(xb, ((0, B_pad - B), (0, 0)))

    def full_block(shape):
        # Whole-array block; index is constant across the grid (weights/biases
        # stay resident, Pallas does not re-DMA constant-index blocks).
        return pl.BlockSpec(shape, lambda i: (0, 0))

    out = pl.pallas_call(
        _mlp_kernel,
        out_shape=jax.ShapeDtypeStruct((B_pad, OUT_PAD), jnp.bfloat16),
        grid=(n_steps,),
        in_specs=[
            pl.BlockSpec((tb, INPUT_SIZE), lambda i: (i, 0)),   # x tile
            full_block(w1b.shape), full_block(b1.shape),
            full_block(w2b.shape), full_block(b2.shape),
            full_block(w3b.shape), full_block(b3p.shape),
        ],
        out_specs=pl.BlockSpec((tb, OUT_PAD), lambda i: (i, 0)),
        compiler_params=pltpu.CompilerParams(
            dimension_semantics=("parallel",),
            vmem_limit_bytes=_vmem_limit_bytes(tb),
        ),
    )(xb, w1b, b1, w2b, b2, w3b, b3p)

    # Tiny slice + upcast; the heavy writeback was already halved by bf16.
    return out[:B, :OUTPUT_SIZE].astype(jnp.float32)


def example_nn_forward(x, prepared_params, *, block_b=2048, num_cores=None):
    """x: [B, 13] float32.  prepared_params: output of prepare_params()."""
    if num_cores is None:
        num_cores = _num_tensorcores()
    tb, n_steps = _choose_grid(x.shape[0], block_b, num_cores)
    return _forward_impl(x, *prepared_params, tb=tb, n_steps=n_steps)


# ----------------------------------------------------------------------------
# Parameter init + references (for the self-test below)
# ----------------------------------------------------------------------------

def init_params(key):
    """Deterministic init mimicking nn.Linear's U(-1/sqrt(fan_in), +1/sqrt(fan_in)).

    Weights are returned as [in, out] (transpose of PyTorch's [out, in]).
    """
    ks = jax.random.split(key, 6)

    def linear(kw, kb, fan_in, fan_out):
        bound = 1.0 / jnp.sqrt(jnp.float32(fan_in))
        w = jax.random.uniform(kw, (fan_in, fan_out), jnp.float32, -bound, bound)
        b = jax.random.uniform(kb, (1, fan_out), jnp.float32, -bound, bound)
        return w, b

    w1, b1 = linear(ks[0], ks[1], INPUT_SIZE, HIDDEN1)
    w2, b2 = linear(ks[2], ks[3], HIDDEN1, HIDDEN2)
    w3, b3 = linear(ks[4], ks[5], HIDDEN2, OUTPUT_SIZE)
    return w1, b1, w2, b2, w3, b3


def reference_forward_f32(x, w1, b1, w2, b2, w3, b3):
    z1 = jnp.maximum(x @ w1 + b1, 0.0)
    z2 = jnp.maximum(z1 @ w2 + b2, 0.0)
    return z2 @ w3 + b3


def reference_forward_bf16(x, w1, b1, w2, b2, w3, b3):
    """Mirrors the kernel's bf16-operand / f32-accumulate math."""
    bf = jnp.bfloat16
    z1 = jnp.dot(x.astype(bf), w1.astype(bf), preferred_element_type=jnp.float32)
    z1 = jnp.maximum(z1 + b1, 0.0)
    z2 = jnp.dot(z1.astype(bf), w2.astype(bf), preferred_element_type=jnp.float32)
    z2 = jnp.maximum(z2 + b2, 0.0)
    z3 = jnp.dot(z2.astype(bf), w3.astype(bf), preferred_element_type=jnp.float32)
    return z3 + b3


if __name__ == "__main__":
    key = jax.random.PRNGKey(0)
    k_params, k_x1, k_x2 = jax.random.split(key, 3)

    params = init_params(k_params)
    prepared = prepare_params(*params)   # one-time weight prep (hoisted)

    # Small primary test (feature width fixed at 13 by the module).
    B = 8
    x = jax.random.normal(k_x1, (B, INPUT_SIZE), jnp.float32)
    out = jax.block_until_ready(example_nn_forward(x, prepared))
    assert out.shape == (B, OUTPUT_SIZE)
    ref_bf16 = reference_forward_bf16(x, *params)
    ref_f32 = reference_forward_f32(x, *params)
    # Kernel stores bf16; compare against the bf16-mirroring reference.
    assert jnp.allclose(out, ref_bf16, atol=2e-2, rtol=2e-2), "mismatch vs bf16 reference"
    # Loose sanity check vs the pure-f32 reference (bf16 matmul operands).
    assert jnp.allclose(out, ref_f32, atol=1.5e-1, rtol=1.5e-1), "mismatch vs f32 reference"

    # Ragged batch with a small tile: exercises batch padding + a multi-step grid.
    B2 = 37
    x2 = jax.random.normal(k_x2, (B2, INPUT_SIZE), jnp.float32)
    out2 = jax.block_until_ready(example_nn_forward(x2, prepared, block_b=16))
    assert out2.shape == (B2, OUTPUT_SIZE)
    ref2 = reference_forward_bf16(x2, *params)
    assert jnp.allclose(out2, ref2, atol=2e-2, rtol=2e-2), "mismatch vs bf16 reference (ragged)"

    print("KERNEL_OK")
</pallas_src>

<mosaic_0001>
module attributes {stable_mosaic.version = 11 : i64} {
  func.func @_mlp_kernel(%arg0: i32, %arg1: memref<8x13xbf16, #tpu.memory_space<vmem>>, %arg2: memref<13x1024xbf16, #tpu.memory_space<vmem>>, %arg3: memref<1x1024xf32, #tpu.memory_space<vmem>>, %arg4: memref<1024x512xbf16, #tpu.memory_space<vmem>>, %arg5: memref<1x512xf32, #tpu.memory_space<vmem>>, %arg6: memref<512x128xbf16, #tpu.memory_space<vmem>>, %arg7: memref<1x128xf32, #tpu.memory_space<vmem>>, %arg8: memref<8x128xbf16, #tpu.memory_space<vmem>>) attributes {dimension_semantics = [#tpu.dimension_semantics<parallel>], iteration_bounds = array<i64: 1>, scalar_prefetch = 0 : i64, scratch_operands = 0 : i64, tpu.core_type = #tpu.core_type<tc>, window_params = [{transform_indices = @transform_0, window_bounds = array<i64: 8, 13>}, {pipeline_mode = #tpu.pipeline_mode<synchronous>, transform_indices = @transform_1, window_bounds = array<i64: 13, 1024>}, {pipeline_mode = #tpu.pipeline_mode<synchronous>, transform_indices = @transform_2, window_bounds = array<i64: 1, 1024>}, {pipeline_mode = #tpu.pipeline_mode<synchronous>, transform_indices = @transform_3, window_bounds = array<i64: 1024, 512>}, {pipeline_mode = #tpu.pipeline_mode<synchronous>, transform_indices = @transform_4, window_bounds = array<i64: 1, 512>}, {pipeline_mode = #tpu.pipeline_mode<synchronous>, transform_indices = @transform_5, window_bounds = array<i64: 512, 128>}, {pipeline_mode = #tpu.pipeline_mode<synchronous>, transform_indices = @transform_6, window_bounds = array<i64: 1, 128>}, {transform_indices = @transform_7, window_bounds = array<i64: 8, 128>}]} {
    %c0 = arith.constant 0 : index
    %c0_0 = arith.constant 0 : index
    %0 = vector.load %arg1[%c0, %c0_0] : memref<8x13xbf16, #tpu.memory_space<vmem>>, vector<8x13xbf16>
    %c0_1 = arith.constant 0 : index
    %c0_2 = arith.constant 0 : index
    %1 = vector.load %arg2[%c0_1, %c0_2] : memref<13x1024xbf16, #tpu.memory_space<vmem>>, vector<13x1024xbf16>
    %cst = arith.constant dense<0.000000e+00> : vector<8x1024xf32>
    %2 = tpu.matmul %0, %1, %cst {dimension_numbers = #tpu.dot_dimension_numbers<[1], [0], [0], [1], [0, 0, 1, 1], [], []>} : vector<8x13xbf16>, vector<13x1024xbf16>, vector<8x1024xf32> -> vector<8x1024xf32>
    %c0_3 = arith.constant 0 : index
    %c0_4 = arith.constant 0 : index
    %3 = vector.load %arg3[%c0_3, %c0_4] : memref<1x1024xf32, #tpu.memory_space<vmem>>, vector<1x1024xf32>
    %4 = vector.broadcast %3 : vector<1x1024xf32> to vector<8x1024xf32>
    %5 = arith.addf %2, %4 : vector<8x1024xf32>
    %cst_5 = arith.constant 0.000000e+00 : f32
    %6 = vector.broadcast %cst_5 : f32 to vector<8x1024xf32>
    %7 = arith.maximumf %5, %6 : vector<8x1024xf32>
    %8 = arith.truncf %7 : vector<8x1024xf32> to vector<8x1024xbf16>
    %c0_6 = arith.constant 0 : index
    %c0_7 = arith.constant 0 : index
    %9 = vector.load %arg4[%c0_6, %c0_7] : memref<1024x512xbf16, #tpu.memory_space<vmem>>, vector<1024x512xbf16>
    %cst_8 = arith.constant dense<0.000000e+00> : vector<8x512xf32>
    %10 = tpu.matmul %8, %9, %cst_8 {dimension_numbers = #tpu.dot_dimension_numbers<[1], [0], [0], [1], [0, 0, 1, 1], [], []>} : vector<8x1024xbf16>, vector<1024x512xbf16>, vector<8x512xf32> -> vector<8x512xf32>
    %c0_9 = arith.constant 0 : index
    %c0_10 = arith.constant 0 : index
    %11 = vector.load %arg5[%c0_9, %c0_10] : memref<1x512xf32, #tpu.memory_space<vmem>>, vector<1x512xf32>
    %12 = vector.broadcast %11 : vector<1x512xf32> to vector<8x512xf32>
    %13 = arith.addf %10, %12 : vector<8x512xf32>
    %cst_11 = arith.constant 0.000000e+00 : f32
    %14 = vector.broadcast %cst_11 : f32 to vector<8x512xf32>
    %15 = arith.maximumf %13, %14 : vector<8x512xf32>
    %16 = arith.truncf %15 : vector<8x512xf32> to vector<8x512xbf16>
    %c0_12 = arith.constant 0 : index
    %c0_13 = arith.constant 0 : index
    %17 = vector.load %arg6[%c0_12, %c0_13] : memref<512x128xbf16, #tpu.memory_space<vmem>>, vector<512x128xbf16>
    %cst_14 = arith.constant dense<0.000000e+00> : vector<8x128xf32>
    %18 = tpu.matmul %16, %17, %cst_14 {dimension_numbers = #tpu.dot_dimension_numbers<[1], [0], [0], [1], [0, 0, 1, 1], [], []>} : vector<8x512xbf16>, vector<512x128xbf16>, vector<8x128xf32> -> vector<8x128xf32>
    %c0_15 = arith.constant 0 : index
    %c0_16 = arith.constant 0 : index
    %19 = vector.load %arg7[%c0_15, %c0_16] : memref<1x128xf32, #tpu.memory_space<vmem>>, vector<1x128xf32>
    %20 = vector.broadcast %19 : vector<1x128xf32> to vector<8x128xf32>
    %21 = arith.addf %18, %20 : vector<8x128xf32>
    %22 = arith.truncf %21 : vector<8x128xf32> to vector<8x128xbf16>
    %c0_17 = arith.constant 0 : index
    %c0_18 = arith.constant 0 : index
    %23 = vector.load %arg8[%c0_17, %c0_18] : memref<8x128xbf16, #tpu.memory_space<vmem>>, vector<8x128xbf16>
    tpu.vector_store %arg8[%c0_17, %c0_18], %22 {strides = array<i32>} : memref<8x128xbf16, #tpu.memory_space<vmem>>, vector<8x128xbf16>,
    return
  }
  func.func @transform_0(%arg0: i32) -> (i32, i32) {
    %c0_i32 = arith.constant 0 : i32
    %c0_i32_0 = arith.constant 0 : i32
    return %arg0, %c0_i32 : i32, i32
  }
  func.func @transform_1(%arg0: i32) -> (i32, i32) {
    %c0_i32 = arith.constant 0 : i32
    %c0_i32_0 = arith.constant 0 : i32
    %c0_i32_1 = arith.constant 0 : i32
    return %c0_i32, %c0_i32_0 : i32, i32
  }
  func.func @transform_2(%arg0: i32) -> (i32, i32) {
    %c0_i32 = arith.constant 0 : i32
    %c0_i32_0 = arith.constant 0 : i32
    %c0_i32_1 = arith.constant 0 : i32
    return %c0_i32, %c0_i32_0 : i32, i32
  }
  func.func @transform_3(%arg0: i32) -> (i32, i32) {
    %c0_i32 = arith.constant 0 : i32
    %c0_i32_0 = arith.constant 0 : i32
    %c0_i32_1 = arith.constant 0 : i32
    return %c0_i32, %c0_i32_0 : i32, i32
  }
  func.func @transform_4(%arg0: i32) -> (i32, i32) {
    %c0_i32 = arith.constant 0 : i32
    %c0_i32_0 = arith.constant 0 : i32
    %c0_i32_1 = arith.constant 0 : i32
    return %c0_i32, %c0_i32_0 : i32, i32
  }
  func.func @transform_5(%arg0: i32) -> (i32, i32) {
    %c0_i32 = arith.constant 0 : i32
    %c0_i32_0 = arith.constant 0 : i32
    %c0_i32_1 = arith.constant 0 : i32
    return %c0_i32, %c0_i32_0 : i32, i32
  }
  func.func @transform_6(%arg0: i32) -> (i32, i32) {
    %c0_i32 = arith.constant 0 : i32
    %c0_i32_0 = arith.constant 0 : i32
    %c0_i32_1 = arith.constant 0 : i32
    return %c0_i32, %c0_i32_0 : i32, i32
  }
  func.func @transform_7(%arg0: i32) -> (i32, i32) {
    %c0_i32 = arith.constant 0 : i32
    %c0_i32_0 = arith.constant 0 : i32
    return %arg0, %c0_i32 : i32, i32
  }
}

</mosaic_0001>

<bundles_post_ra>
// kernel: _forward_impl.1
= control target key start
LH: loop header
LB: loop body
LE: loop exit
PB: predicated region body
PF: predicated region fallthrough
CT: control target
= control target key end

     0   :  { %12 = vsyncpa [#allocation3], 0  ;;  %s4336_s0 = inlined_call_operand.vmem [shape: bf16[8,13], index: 0, kind: input, shape index: {}]   ;;  %s4337_s1 = inlined_call_operand.hbm [shape: bf16[13,1024], index: 1, kind: input, shape index: {}]   ;;  %s4338_s2 = inlined_call_operand.vmem [shape: f32[1,1024], index: 2, kind: input, shape index: {}]   ;;  %s4339_s3 = inlined_call_operand.hbm [shape: bf16[1024,512], index: 3, kind: input, shape index: {}]   ;;  %s4340_s4 = inlined_call_operand.vmem [shape: f32[1,512], index: 4, kind: input, shape index: {}]   ;;  %s4341_s5 = inlined_call_operand.hbm [shape: bf16[512,128], index: 5, kind: input, shape index: {}]   ;;  %s4342_s6 = inlined_call_operand.vmem [shape: f32[1,128], index: 6, kind: input, shape index: {}]   ;;  %s4343_s7 = inlined_call_operand.vmem [shape: bf16[8,128], index: 7, kind: output, shape index: {}]  }
   0x1   :  { %13 = vsyncpa [#allocation5], 0  ;;  %s35_s26 = sshll.u32 %s4339_s3, 4  ;;  %s4150_s27 = smov [#allocation4]   ;;  %s36_s26 = int_to_ptr.hbm [resolvable:$true] %s35_s26 }
   0x2   :  { %s37_s28 = sshll.u32 %s4150_s27, 4  ;;  %s20_s8 = sshll.u32 %s4337_s1, 4  ;;  %s38_s28 = int_to_ptr.vmem [resolvable:$true] %s37_s28  ;;  %s21_s8 = int_to_ptr.hbm [resolvable:$true] %s20_s8 }
   0x3   :  { %s4151_s9 = smov 256   ;;  %s4152_s10 = smov 16  }
   0x4   :  { %43 = dma.hbm_to_vmem [thread:$0]  %s36_s26, 32768, %s38_s28, [#allocation5], %s4151_s9, %s4151_s9, %s4152_s10  }
   0x5   :  { %s4153_s11 = smov [#allocation2]   ;;  %s4154_s13 = smov 512  }
   0x6   :  { %s22_s12 = sshll.u32 %s4153_s11, 4  ;;  %s4155_s14 = smov 32   ;;  %s23_s12 = int_to_ptr.vmem [resolvable:$true] %s22_s12 }
   0x7   :  { %28 = dma.hbm_to_vmem [thread:$0]  %s21_s8, 1024, %s23_s12, [#allocation3], %s4154_s13, %s4154_s13, %s4155_s14  }
   0x8   :  { %s50_s16 = sshll.u32 %s4341_s5, 4  ;;  %s4156_s17 = smov [#allocation6]   ;;  %s51_s16 = int_to_ptr.hbm [resolvable:$true] %s50_s16 }
   0x9   :  { %s52_s18 = sshll.u32 %s4156_s17, 4  ;;  %s4157_s19 = smov 64   ;;  %s53_s18 = int_to_ptr.vmem [resolvable:$true] %s52_s18 }
   0xa   :  { %s4158_s1 = smov 4  }
   0xb   :  { %58 = dma.hbm_to_vmem [thread:$0]  %s51_s16, 4096, %s53_s18, [#allocation5], %s4157_s19, %s4157_s19, %s4158_s1  }
   0xc   :  { %4146 = dma.done.wait [#allocation3], 1024  }
   0xd   :  { %4147 = vsyncadd [#allocation3], 4294966272 }
   0xe   :  { %4148 = dma.done.wait [#allocation5], 36864  }
   0xf   :  { %4149 = vsyncadd [#allocation5], 4294930432  ;;  %vm137_vm0 = vcmask 1045504   ;;  %vm138_vm1 = vcmask 1046528   ;;  %v4159_v0 = vmov 65535   ;;  %vm133_vm2 = vcmask 105472  }
  0x10   :  { %v139_v1 = vsel %vm137_vm0, 4294967295, %v4159_v0  ;;  %v2577_v3 = vld [vmem:[#allocation2] sm:$0xf]  ;;  %v3767_v5 = vld [vmem:[#allocation2 + $0x4] sm:$0xf] }
  0x11   :  { %v140_v2 = vsel %vm138_vm1, %v139_v1, 0  ;;  %v3771_v4 = vld [vmem:[#allocation2 + $0x1c] sm:$0x70]  ;;  %v2579_v7 = vld [vmem:[#allocation2 + $0x20] sm:$0x70] }
  0x12   :  { %v2578_v6 = vor.u32 %v3771_v4, %v2577_v3  ;;  %v2585_v8 = vld [vmem:[#allocation2 + $0x8] sm:$0xf]  ;;  %v2582_v10 = vor.u32 %v3767_v5, %v2579_v7  ;;  %v3768_v12 = vld [vmem:[#allocation2 + $0xc] sm:$0xf]  ;;  %v4212_v16 = vld [vmem:[%s4336_s0] sm:$0xf] }
  0x13   :  { %v3772_v9 = vld [vmem:[#allocation2 + $0x24] sm:$0x70]  ;;  %v2587_v13 = vld [vmem:[#allocation2 + $0x28] sm:$0x70]  ;;  %v2593_v17 = vld [vmem:[#allocation2 + $0x10] sm:$0xf] }
  0x14   :  { %v2586_v11 = vor.u32 %v3772_v9, %v2585_v8  ;;  %v142_v14 = vand.u32 %v2578_v6, %v140_v2  ;;  %v2590_v15 = vor.u32 %v3768_v12, %v2587_v13  ;;  %v3773_v18 = vld [vmem:[#allocation2 + $0x2c] sm:$0x70]  ;;  %v3769_v19 = vld [vmem:[#allocation2 + $0x14] sm:$0xf]  ;;  %v145_v20 = vand.u32 %v2582_v10, %v140_v2  ;;  %v2601_v24 = vld [vmem:[#allocation2 + $0x18] sm:$0xf] }
  0x15   :  { %v2594_v22 = vor.u32 %v3773_v18, %v2593_v17  ;;  %v2595_v23 = vld [vmem:[#allocation2 + $0x30] sm:$0x70]  ;;  %v3774_v25 = vld [vmem:[#allocation2 + $0x34] sm:$0x70]  ;;  %v3770_v29 = vld [vmem:[#allocation2 + $0x1c] sm:$0xf] }
  0x16   :  { %v148_v21 = vand.u32 %v2586_v11, %v140_v2  ;;  %172 = vmatpush.bf16.msra.mxu0 %v142_v14  ;;  %v151_v26 = vand.u32 %v2590_v15, %v140_v2  ;;  %v2598_v27 = vor.u32 %v3769_v19, %v2595_v23  ;;  %v2602_v28 = vor.u32 %v3774_v25, %v2601_v24  ;;  %v2603_v30 = vld [vmem:[#allocation2 + $0x38] sm:$0x70]  ;;  %v2729_v31 = vld [vmem:[#allocation4 + $0xe0] sm:$0xf]  ;;  %v3805_v34 = vld [vmem:[#allocation4 + $0xec] sm:$0xf0] }
  0x17   :  { %185 = vmatpush.bf16.msra.mxu1 %v145_v20  ;;  %v154_v32 = vand.u32 %v2594_v22, %v140_v2  ;;  %v2606_v33 = vor.u32 %v3770_v29, %v2603_v30  ;;  %v2857_v35 = vld [vmem:[#allocation4 + $0x1e0] sm:$0xf]  ;;  %v3837_v36 = vld [vmem:[#allocation4 + $0x1ec] sm:$0xf0]  ;;  %v2730_v40 = vor.u32 %v3805_v34, %v2729_v31 }
  0x18   :  { %198 = vmatpush.bf16.msra.mxu2 %v148_v21  ;;  %211 = vmatpush.bf16.msra.mxu3 %v151_v26  ;;  %v157_v37 = vand.u32 %v2598_v27, %v140_v2  ;;  %v160_v38 = vand.u32 %v2602_v28, %v140_v2  ;;  %v2713_v41 = vld [vmem:[#allocation4 + $0xc0] sm:$0xf]  ;;  %v3869_v43 = vld [vmem:[#allocation4 + $0x2ec] sm:$0xf0]  ;;  %v2858_v44 = vor.u32 %v3837_v36, %v2857_v35 }
  0x19   :  { %2607 = vmatmul.msk.bf16.vlgmr.msra.gmra.mxu0 %vm133_vm2, %v4212_v16  ;;  %v163_v39 = vand.u32 %v2606_v33, %v140_v2  ;;  %v2985_v42 = vld [vmem:[#allocation4 + $0x2e0] sm:$0xf]  ;;  %v3801_v45 = vld [vmem:[#allocation4 + $0xcc] sm:$0xf0] }
  0x1a   :  { %2608 = vmatmul.msk.bf16.vlgmr.msra.gmra.mxu1 %vm133_vm2, %v4212_v16  ;;  %v2986_v46 = vor.u32 %v3869_v43, %v2985_v42  ;;  %v3113_v47 = vld [vmem:[#allocation4 + $0x3e0] sm:$0xf]  ;;  %v3901_v48 = vld [vmem:[#allocation4 + $0x3ec] sm:$0xf0]  ;;  %224 = vmatpush.bf16.msrb.mxu0 %v154_v32  ;;  %v2714_v55 = vor.u32 %v3801_v45, %v2713_v41 }
  0x1b   :  { %2609 = vmatmul.msk.bf16.vlgmr.msra.gmra.mxu2 %vm133_vm2, %v4212_v16  ;;  %2610 = vmatmul.msk.bf16.vlgmr.msra.gmra.mxu3 %vm133_vm2, %v4212_v16  ;;  %v2841_v49 = vld [vmem:[#allocation4 + $0x1c0] sm:$0xf]  ;;  %v3833_v50 = vld [vmem:[#allocation4 + $0x1cc] sm:$0xf0]  ;;  %v3114_v51 = vor.u32 %v3901_v48, %v3113_v47 }
  0x1c   :  { %237 = vmatpush.bf16.msrb.mxu1 %v157_v37  ;;  %250 = vmatpush.bf16.msrb.mxu2 %v160_v38  ;;  %v2969_v52 = vld [vmem:[#allocation4 + $0x2c0] sm:$0xf]  ;;  %v3865_v53 = vld [vmem:[#allocation4 + $0x2cc] sm:$0xf0]  ;;  %v2842_v57 = vor.u32 %v3833_v50, %v2841_v49 }
  0x1d   :  { %v3097_v54 = vld [vmem:[#allocation4 + $0x3c0] sm:$0xf]  ;;  %263 = vmatpush.bf16.msrb.mxu3 %v163_v39  ;;  %v3897_v56 = vld [vmem:[#allocation4 + $0x3cc] sm:$0xf0]  ;;  %v2970_v61 = vor.u32 %v3865_v53, %v2969_v52 }
  0x1e   :  { %1831 = vmatpush.bf16.msra.mxu0 %v2730_v40  ;;  %v2697_v58 = vld [vmem:[#allocation4 + $0xa0] sm:$0xf]  ;;  %v3797_v59 = vld [vmem:[#allocation4 + $0xac] sm:$0xf0]  ;;  %v3098_v63 = vor.u32 %v3897_v56, %v3097_v54 }
  0x1f   :  { %v2825_v60 = vld [vmem:[#allocation4 + $0x1a0] sm:$0xf]  ;;  %v3829_v62 = vld [vmem:[#allocation4 + $0x1ac] sm:$0xf0]  ;;  %v2698_v4 = vor.u32 %v3797_v59, %v2697_v58 }
  0x20   :  { %1844 = vmatpush.bf16.msra.mxu1 %v2858_v44  ;;  %1857 = vmatpush.bf16.msra.mxu2 %v2986_v46  ;;  %v2953_v0 = vld [vmem:[#allocation4 + $0x2a0] sm:$0xf]  ;;  %v3861_v1 = vld [vmem:[#allocation4 + $0x2ac] sm:$0xf0]  ;;  %v2826_v5 = vor.u32 %v3829_v62, %v2825_v60 }
  0x21   :  { %1870 = vmatpush.bf16.msra.mxu3 %v3114_v51  ;;  %v3081_v2 = vld [vmem:[#allocation4 + $0x3a0] sm:$0xf]  ;;  %v3893_v3 = vld [vmem:[#allocation4 + $0x3ac] sm:$0xf0]  ;;  %v2954_v6 = vor.u32 %v3861_v1, %v2953_v0 }
  0x22   :  { %1832 = vmatpush.bf16.msra.mxu0 %v2714_v55  ;;  %v3082_v7 = vor.u32 %v3893_v3, %v3081_v2  ;;  %v2681_v8 = vld [vmem:[#allocation4 + $0x80] sm:$0xf]  ;;  %v3793_v9 = vld [vmem:[#allocation4 + $0x8c] sm:$0xf0] }
  0x23   :  { %v2809_v10 = vld [vmem:[#allocation4 + $0x180] sm:$0xf]  ;;  %v3825_v11 = vld [vmem:[#allocation4 + $0x18c] sm:$0xf0]  ;;  %v2682_v17 = vor.u32 %v3793_v9, %v2681_v8 }
  0x24   :  { %1845 = vmatpush.bf16.msra.mxu1 %v2842_v57  ;;  %1858 = vmatpush.bf16.msra.mxu2 %v2970_v61  ;;  %v2937_v12 = vld [vmem:[#allocation4 + $0x280] sm:$0xf]  ;;  %v3857_v13 = vld [vmem:[#allocation4 + $0x28c] sm:$0xf0]  ;;  %v2810_v18 = vor.u32 %v3825_v11, %v2809_v10 }
  0x25   :  { %1871 = vmatpush.bf16.msra.mxu3 %v3098_v63  ;;  %v3065_v14 = vld [vmem:[#allocation4 + $0x380] sm:$0xf]  ;;  %v3889_v15 = vld [vmem:[#allocation4 + $0x38c] sm:$0xf0]  ;;  %v2938_v22 = vor.u32 %v3857_v13, %v2937_v12 }
  0x26   :  { %1833 = vmatpush.bf16.msra.mxu0 %v2698_v4  ;;  %v2665_v19 = vld [vmem:[#allocation4 + $0x60] sm:$0xf]  ;;  %v3789_v20 = vld [vmem:[#allocation4 + $0x6c] sm:$0xf0]  ;;  %v3066_v24 = vor.u32 %v3889_v15, %v3065_v14 }
  0x27   :  { %v2793_v21 = vld [vmem:[#allocation4 + $0x160] sm:$0xf]  ;;  %v3821_v23 = vld [vmem:[#allocation4 + $0x16c] sm:$0xf0]  ;;  %v2666_v29 = vor.u32 %v3789_v20, %v2665_v19 }
  0x28   :  { %1846 = vmatpush.bf16.msra.mxu1 %v2826_v5  ;;  %1859 = vmatpush.bf16.msra.mxu2 %v2954_v6  ;;  %v2921_v25 = vld [vmem:[#allocation4 + $0x260] sm:$0xf]  ;;  %v3853_v26 = vld [vmem:[#allocation4 + $0x26c] sm:$0xf0]  ;;  %v2794_v30 = vor.u32 %v3821_v23, %v2793_v21 }
  0x29   :  { %1872 = vmatpush.bf16.msra.mxu3 %v3082_v7  ;;  %2611 = vmatmul.msk.bf16.vlgmr.msrb.gmra.mxu0 %vm133_vm2, %v4212_v16  ;;  %v3049_v27 = vld [vmem:[#allocation4 + $0x360] sm:$0xf]  ;;  %v3885_v28 = vld [vmem:[#allocation4 + $0x36c] sm:$0xf0]  ;;  %v2922_v34 = vor.u32 %v3853_v26, %v2921_v25 }
  0x2a   :  { %2612 = vmatmul.msk.bf16.vlgmr.msrb.gmra.mxu1 %vm133_vm2, %v4212_v16  ;;  %1834 = vmatpush.bf16.msra.mxu0 %v2682_v17  ;;  %v2649_v31 = vld [vmem:[#allocation4 + $0x40] sm:$0xf]  ;;  %v3785_v32 = vld [vmem:[#allocation4 + $0x4c] sm:$0xf0]  ;;  %v3050_v36 = vor.u32 %v3885_v28, %v3049_v27 }
  0x2b   :  { %2613 = vmatmul.msk.bf16.vlgmr.msrb.gmra.mxu2 %vm133_vm2, %v4212_v16  ;;  %2614 = vmatmul.msk.bf16.vlgmr.msrb.gmra.mxu3 %vm133_vm2, %v4212_v16  ;;  %v2777_v33 = vld [vmem:[#allocation4 + $0x140] sm:$0xf]  ;;  %v3817_v35 = vld [vmem:[#allocation4 + $0x14c] sm:$0xf0]  ;;  %v2650_v41 = vor.u32 %v3785_v32, %v2649_v31 }
  0x2c   :  { %1847 = vmatpush.bf16.msra.mxu1 %v2810_v18  ;;  %1860 = vmatpush.bf16.msra.mxu2 %v2938_v22  ;;  %v2905_v37 = vld [vmem:[#allocation4 + $0x240] sm:$0xf]  ;;  %v3849_v38 = vld [vmem:[#allocation4 + $0x24c] sm:$0xf0]  ;;  %v2778_v16 = vor.u32 %v3817_v35, %v2777_v33 }
  0x2d   :  { %1873 = vmatpush.bf16.msra.mxu3 %v3066_v24  ;;  %v3033_v39 = vld [vmem:[#allocation4 + $0x340] sm:$0xf]  ;;  %v3881_v40 = vld [vmem:[#allocation4 + $0x34c] sm:$0xf0]  ;;  %v2906_v45 = vor.u32 %v3849_v38, %v2905_v37 }
  0x2e   :  { %1835 = vmatpush.bf16.msra.mxu0 %v2666_v29  ;;  %v2633_v42 = vld [vmem:[#allocation4 + $0x20] sm:$0xf]  ;;  %v3781_v43 = vld [vmem:[#allocation4 + $0x2c] sm:$0xf0]  ;;  %v3034_v47 = vor.u32 %v3881_v40, %v3033_v39 }
  0x2f   :  { %v2761_v44 = vld [vmem:[#allocation4 + $0x120] sm:$0xf]  ;;  %v3813_v46 = vld [vmem:[#allocation4 + $0x12c] sm:$0xf0]  ;;  %v2634_v52 = vor.u32 %v3781_v43, %v2633_v42 }
  0x30   :  { %1848 = vmatpush.bf16.msra.mxu1 %v2794_v30  ;;  %1861 = vmatpush.bf16.msra.mxu2 %v2922_v34  ;;  %v2889_v48 = vld [vmem:[#allocation4 + $0x220] sm:$0xf]  ;;  %v3845_v49 = vld [vmem:[#allocation4 + $0x22c] sm:$0xf0]  ;;  %v2762_v55 = vor.u32 %v3813_v46, %v2761_v44 }
  0x31   :  { %1874 = vmatpush.bf16.msra.mxu3 %v3050_v36  ;;  %v3017_v50 = vld [vmem:[#allocation4 + $0x320] sm:$0xf]  ;;  %v3877_v51 = vld [vmem:[#allocation4 + $0x32c] sm:$0xf0]  ;;  %v2890_v59 = vor.u32 %v3845_v49, %v2889_v48 }
  0x32   :  { %1836 = vmatpush.bf16.msra.mxu0 %v2650_v41  ;;  %v2617_v53 = vld [vmem:[#allocation4] sm:$0xf]  ;;  %v3777_v54 = vld [vmem:[#allocation4 + $0xc] sm:$0xf0]  ;;  %v3018_v63 = vor.u32 %v3877_v51, %v3017_v50 }
  0x33   :  { %v2745_v56 = vld [vmem:[#allocation4 + $0x100] sm:$0xf]  ;;  %v3809_v57 = vld [vmem:[#allocation4 + $0x10c] sm:$0xf0]  ;;  %v2618_v3 = vor.u32 %v3777_v54, %v2617_v53 }
  0x34   :  { %1849 = vmatpush.bf16.msra.mxu1 %v2778_v16  ;;  %1862 = vmatpush.bf16.msra.mxu2 %v2906_v45  ;;  %v3241_v58 = vld [vmem:[#allocation4 + $0x4e0] sm:$0xf]  ;;  %v3933_v60 = vld [vmem:[#allocation4 + $0x4ec] sm:$0xf0]  ;;  %v2746_v7 = vor.u32 %v3809_v57, %v2745_v56 }
  0x35   :  { %1875 = vmatpush.bf16.msra.mxu3 %v3034_v47  ;;  %v3369_v61 = vld [vmem:[#allocation4 + $0x5e0] sm:$0xf]  ;;  %v3965_v62 = vld [vmem:[#allocation4 + $0x5ec] sm:$0xf0]  ;;  %v3242_v8 = vor.u32 %v3933_v60, %v3241_v58 }
  0x36   :  { %v2873_v0 = vld [vmem:[#allocation4 + $0x200] sm:$0xf]  ;;  %v3841_v1 = vld [vmem:[#allocation4 + $0x20c] sm:$0xf0]  ;;  %1837 = vmatpush.bf16.msra.mxu0 %v2634_v52  ;;  %v3370_v11 = vor.u32 %v3965_v62, %v3369_v61 }
  0x37   :  { %v3001_v2 = vld [vmem:[#allocation4 + $0x300] sm:$0xf]  ;;  %v3873_v4 = vld [vmem:[#allocation4 + $0x30c] sm:$0xf0]  ;;  %v2874_v14 = vor.u32 %v3841_v1, %v2873_v0 }
  0x38   :  { %v3497_v5 = vld [vmem:[#allocation4 + $0x6e0] sm:$0xf]  ;;  %v3997_v6 = vld [vmem:[#allocation4 + $0x6ec] sm:$0xf0]  ;;  %1850 = vmatpush.bf16.msra.mxu1 %v2762_v55  ;;  %1863 = vmatpush.bf16.msra.mxu2 %v2890_v59  ;;  %v3002_v18 = vor.u32 %v3873_v4, %v3001_v2 }
  0x39   :  { %v3625_v9 = vld [vmem:[#allocation4 + $0x7e0] sm:$0xf]  ;;  %v4029_v10 = vld [vmem:[#allocation4 + $0x7ec] sm:$0xf0]  ;;  %1876 = vmatpush.bf16.msra.mxu3 %v3018_v63  ;;  %v3498_v19 = vor.u32 %v3997_v6, %v3497_v5 }
  0x3a   :  { %v3225_v12 = vld [vmem:[#allocation4 + $0x4c0] sm:$0xf]  ;;  %v3929_v13 = vld [vmem:[#allocation4 + $0x4cc] sm:$0xf0]  ;;  %1838 = vmatpush.bf16.msra.mxu0 %v2618_v3  ;;  %v3626_v20 = vor.u32 %v4029_v10, %v3625_v9 }
  0x3b   :  { %v3353_v15 = vld [vmem:[#allocation4 + $0x5c0] sm:$0xf]  ;;  %v3961_v17 = vld [vmem:[#allocation4 + $0x5cc] sm:$0xf0]  ;;  %v3226_v23 = vor.u32 %v3929_v13, %v3225_v12 }
  0x3c   :  { %v3481_v21 = vld [vmem:[#allocation4 + $0x6c0] sm:$0xf]  ;;  %v3993_v22 = vld [vmem:[#allocation4 + $0x6cc] sm:$0xf0]  ;;  %1851 = vmatpush.bf16.msra.mxu1 %v2746_v7  ;;  %v3354_v26 = vor.u32 %v3961_v17, %v3353_v15  ;;  %1864 = vmatpush.bf16.msra.mxu2 %v2874_v14 }
  0x3d   :  { %v3609_v24 = vld [vmem:[#allocation4 + $0x7c0] sm:$0xf]  ;;  %v4025_v25 = vld [vmem:[#allocation4 + $0x7cc] sm:$0xf0]  ;;  %1877 = vmatpush.bf16.msra.mxu3 %v3002_v18  ;;  %v3482_v31 = vor.u32 %v3993_v22, %v3481_v21 }
  0x3e   :  { %1883 = vmatpush.bf16.msrb.mxu0 %v3242_v8  ;;  %v3209_v27 = vld [vmem:[#allocation4 + $0x4a0] sm:$0xf]  ;;  %v3925_v28 = vld [vmem:[#allocation4 + $0x4ac] sm:$0xf0]  ;;  %v3610_v32 = vor.u32 %v4025_v25, %v3609_v24 }
  0x3f   :  { %v3337_v29 = vld [vmem:[#allocation4 + $0x5a0] sm:$0xf]  ;;  %v3957_v30 = vld [vmem:[#allocation4 + $0x5ac] sm:$0xf0]  ;;  %v3210_v35 = vor.u32 %v3925_v28, %v3209_v27 }
  0x40   :  { %1896 = vmatpush.bf16.msrb.mxu1 %v3370_v11  ;;  %1909 = vmatpush.bf16.msrb.mxu2 %v3498_v19  ;;  %v3465_v33 = vld [vmem:[#allocation4 + $0x6a0] sm:$0xf]  ;;  %v3989_v34 = vld [vmem:[#allocation4 + $0x6ac] sm:$0xf0]  ;;  %v3338_v38 = vor.u32 %v3957_v30, %v3337_v29 }
  0x41   :  { %1922 = vmatpush.bf16.msrb.mxu3 %v3626_v20  ;;  %v3593_v36 = vld [vmem:[#allocation4 + $0x7a0] sm:$0xf]  ;;  %v4021_v37 = vld [vmem:[#allocation4 + $0x7ac] sm:$0xf0]  ;;  %v3466_v42 = vor.u32 %v3989_v34, %v3465_v33 }
  0x42   :  { %1884 = vmatpush.bf16.msrb.mxu0 %v3226_v23  ;;  %v3193_v39 = vld [vmem:[#allocation4 + $0x480] sm:$0xf]  ;;  %v3921_v40 = vld [vmem:[#allocation4 + $0x48c] sm:$0xf0]  ;;  %v3594_v43 = vor.u32 %v4021_v37, %v3593_v36 }
  0x43   :  { %v3321_v41 = vld [vmem:[#allocation4 + $0x580] sm:$0xf]  ;;  %v3953_v16 = vld [vmem:[#allocation4 + $0x58c] sm:$0xf0]  ;;  %v3194_v46 = vor.u32 %v3921_v40, %v3193_v39 }
  0x44   :  { %1897 = vmatpush.bf16.msrb.mxu1 %v3354_v26  ;;  %1910 = vmatpush.bf16.msrb.mxu2 %v3482_v31  ;;  %v3449_v44 = vld [vmem:[#allocation4 + $0x680] sm:$0xf]  ;;  %v3985_v45 = vld [vmem:[#allocation4 + $0x68c] sm:$0xf0]  ;;  %v3322_v49 = vor.u32 %v3953_v16, %v3321_v41 }
  0x45   :  { %1923 = vmatpush.bf16.msrb.mxu3 %v3610_v32  ;;  %v3577_v47 = vld [vmem:[#allocation4 + $0x780] sm:$0xf]  ;;  %v4017_v48 = vld [vmem:[#allocation4 + $0x78c] sm:$0xf0]  ;;  %v3450_v54 = vor.u32 %v3985_v45, %v3449_v44  ;;  %v3835_v45 = vld [vmem:[#allocation4 + $0x1e4] sm:$0xf] }
  0x46   :  { %1885 = vmatpush.bf16.msrb.mxu0 %v3210_v35  ;;  %v3177_v50 = vld [vmem:[#allocation4 + $0x460] sm:$0xf]  ;;  %v3917_v51 = vld [vmem:[#allocation4 + $0x46c] sm:$0xf0]  ;;  %v3578_v55 = vor.u32 %v4017_v48, %v3577_v47 }
  0x47   :  { %v3305_v52 = vld [vmem:[#allocation4 + $0x560] sm:$0xf]  ;;  %v3949_v53 = vld [vmem:[#allocation4 + $0x56c] sm:$0xf0]  ;;  %v3178_v56 = vor.u32 %v3917_v51, %v3177_v50 }
  0x48   :  { %1898 = vmatpush.bf16.msrb.mxu1 %v3338_v38  ;;  %1911 = vmatpush.bf16.msrb.mxu2 %v3466_v42  ;;  %v3306_v57 = vor.u32 %v3949_v53, %v3305_v52  ;;  %v3161_v58 = vld [vmem:[#allocation4 + $0x440] sm:$0xf]  ;;  %v3913_v59 = vld [vmem:[#allocation4 + $0x44c] sm:$0xf0]  ;;  %v3803_v42 = vld [vmem:[#allocation4 + $0xe4] sm:$0xf] }
  0x49   :  { %1924 = vmatpush.bf16.msrb.mxu3 %v3594_v43  ;;  %v3289_v60 = vld [vmem:[#allocation4 + $0x540] sm:$0xf]  ;;  %v3945_v61 = vld [vmem:[#allocation4 + $0x54c] sm:$0xf0]  ;;  %v3162_v62 = vor.u32 %v3913_v59, %v3161_v58  ;;  %v2731_v43 = vld [vmem:[#allocation4 + $0xf0] sm:$0xf0] }
  0x4a   :  { %1886 = vmatpush.bf16.msrb.mxu0 %v3194_v46  ;;  %v3290_v63 = vor.u32 %v3945_v61, %v3289_v60  ;;  %v3433_v0 = vld [vmem:[#allocation4 + $0x660] sm:$0xf]  ;;  %v3981_v1 = vld [vmem:[#allocation4 + $0x66c] sm:$0xf0]  ;;  %v2859_v46 = vld [vmem:[#allocation4 + $0x1f0] sm:$0xf0]  ;;  %v2734_v50 = vor.u32 %v3803_v42, %v2731_v43 }
  0x4b   :  { %v3561_v2 = vld [vmem:[#allocation4 + $0x760] sm:$0xf]  ;;  %v3434_v3 = vor.u32 %v3981_v1, %v3433_v0  ;;  %v4013_v4 = vld [vmem:[#allocation4 + $0x76c] sm:$0xf0]  ;;  %v2862_v53 = vor.u32 %v3835_v45, %v2859_v46  ;;  %v2843_v58 = vld [vmem:[#allocation4 + $0x1d0] sm:$0xf0] }
  0x4c   :  { %1899 = vmatpush.bf16.msrb.mxu1 %v3322_v49  ;;  %1912 = vmatpush.bf16.msrb.mxu2 %v3450_v54  ;;  %v3562_v5 = vor.u32 %v4013_v4, %v3561_v2  ;;  %v3145_v6 = vld [vmem:[#allocation4 + $0x420] sm:$0xf]  ;;  %v3909_v7 = vld [vmem:[#allocation4 + $0x42c] sm:$0xf0]  ;;  %v3799_v54 = vld [vmem:[#allocation4 + $0xc4] sm:$0xf] }
  0x4d   :  { %1925 = vmatpush.bf16.msrb.mxu3 %v3578_v55  ;;  %v3146_v8 = vor.u32 %v3909_v7, %v3145_v6  ;;  %v3273_v9 = vld [vmem:[#allocation4 + $0x520] sm:$0xf]  ;;  %v3941_v10 = vld [vmem:[#allocation4 + $0x52c] sm:$0xf0]  ;;  %v2715_v55 = vld [vmem:[#allocation4 + $0xd0] sm:$0xf0] }
  0x4e   :  { %1887 = vmatpush.bf16.msrb.mxu0 %v3178_v56  ;;  %v3274_v11 = vor.u32 %v3941_v10, %v3273_v9  ;;  %v3417_v12 = vld [vmem:[#allocation4 + $0x640] sm:$0xf]  ;;  %v3977_v13 = vld [vmem:[#allocation4 + $0x64c] sm:$0xf0]  ;;  %v3867_v0 = vld [vmem:[#allocation4 + $0x2e4] sm:$0xf] }
  0x4f   :  { %v3545_v14 = vld [vmem:[#allocation4 + $0x740] sm:$0xf]  ;;  %v3418_v15 = vor.u32 %v3977_v13, %v3417_v12  ;;  %v4009_v17 = vld [vmem:[#allocation4 + $0x74c] sm:$0xf0]  ;;  %v2987_v1 = vld [vmem:[#allocation4 + $0x2f0] sm:$0xf0] }
  0x50   :  { %1900 = vmatpush.bf16.msrb.mxu1 %v3306_v57  ;;  %1913 = vmatpush.bf16.msrb.mxu2 %v3434_v3  ;;  %v3546_v18 = vor.u32 %v4009_v17, %v3545_v14  ;;  %v3129_v19 = vld [vmem:[#allocation4 + $0x400] sm:$0xf]  ;;  %v3905_v20 = vld [vmem:[#allocation4 + $0x40c] sm:$0xf0]  ;;  %v3831_v57 = vld [vmem:[#allocation4 + $0x1c4] sm:$0xf]  ;;  %v2990_v13 = vor.u32 %v3867_v0, %v2987_v1 }
  0x51   :  { %1926 = vmatpush.bf16.msrb.mxu3 %v3562_v5  ;;  %v3257_v21 = vld [vmem:[#allocation4 + $0x500] sm:$0xf]  ;;  %v3130_v22 = vor.u32 %v3905_v20, %v3129_v19  ;;  %v3937_v23 = vld [vmem:[#allocation4 + $0x50c] sm:$0xf0]  ;;  %v3899_v2 = vld [vmem:[#allocation4 + $0x3e4] sm:$0xf]  ;;  %v2846_v5 = vor.u32 %v3831_v57, %v2843_v58 }
  0x52   :  { %1888 = vmatpush.bf16.msrb.mxu0 %v3162_v62  ;;  %v3258_v24 = vor.u32 %v3937_v23, %v3257_v21  ;;  %v3401_v25 = vld [vmem:[#allocation4 + $0x620] sm:$0xf]  ;;  %v3973_v26 = vld [vmem:[#allocation4 + $0x62c] sm:$0xf0]  ;;  %v3115_v6 = vld [vmem:[#allocation4 + $0x3f0] sm:$0xf0] }
  0x53   :  { %v3402_v27 = vor.u32 %v3973_v26, %v3401_v25  ;;  %v3529_v28 = vld [vmem:[#allocation4 + $0x720] sm:$0xf]  ;;  %v4005_v29 = vld [vmem:[#allocation4 + $0x72c] sm:$0xf0]  ;;  %v3795_v7 = vld [vmem:[#allocation4 + $0xa4] sm:$0xf]  ;;  %v3118_v17 = vor.u32 %v3899_v2, %v3115_v6 }
  0x54   :  { %1901 = vmatpush.bf16.msrb.mxu1 %v3290_v63  ;;  %1914 = vmatpush.bf16.msrb.mxu2 %v3418_v15  ;;  %v3530_v30 = vor.u32 %v4005_v29, %v3529_v28  ;;  %v3385_v31 = vld [vmem:[#allocation4 + $0x600] sm:$0xf]  ;;  %v3969_v32 = vld [vmem:[#allocation4 + $0x60c] sm:$0xf0]  ;;  %v2718_v63 = vor.u32 %v3799_v54, %v2715_v55  ;;  %v3827_v10 = vld [vmem:[#allocation4 + $0x1a4] sm:$0xf] }
  0x55   :  { %1927 = vmatpush.bf16.msrb.mxu3 %v3546_v18  ;;  %v3386_v33 = vor.u32 %v3969_v32, %v3385_v31  ;;  %v3513_v34 = vld [vmem:[#allocation4 + $0x700] sm:$0xf]  ;;  %v4001_v35 = vld [vmem:[#allocation4 + $0x70c] sm:$0xf0]  ;;  %v3863_v19 = vld [vmem:[#allocation4 + $0x2c4] sm:$0xf] }
  0x56   :  { %1889 = vmatpush.bf16.msrb.mxu0 %v3146_v8  ;;  %v3514_v36 = vor.u32 %v4001_v35, %v3513_v34  ;;  %v4233_v37 = vld [vmem:[%s4338_s2] sm:$0xff]  ;;  %v2699_v8 = vld [vmem:[#allocation4 + $0xb0] sm:$0xf0] }
  0x57   :  { %v85_v38 = vperm.slane %v4233_v37, 0  ;;  %v86_v39 = vperm.slane %v4233_v37, 1  ;;  %v87_v49 = vperm.slane %v4233_v37, 2  ;;  %v88_v52 = vperm.slane %v4233_v37, 3  ;;  %v2971_v20 = vld [vmem:[#allocation4 + $0x2d0] sm:$0xf0] }
  0x58   :  { %1902 = vmatpush.bf16.msrb.mxu1 %v3274_v11  ;;  %1915 = vmatpush.bf16.msrb.mxu2 %v3402_v27  ;;  %v2827_v11 = vld [vmem:[#allocation4 + $0x1b0] sm:$0xf0]  ;;  %v89_v14 = vperm.slane %v4233_v37, 4  ;;  %v2702_v18 = vor.u32 %v3795_v7, %v2699_v8  ;;  %v3895_v21 = vld [vmem:[#allocation4 + $0x3c4] sm:$0xf]  ;;  %v90_v27 = vperm.slane %v4233_v37, 5  ;;  %v2974_v31 = vor.u32 %v3863_v19, %v2971_v20 }
  0x59   :  { %1928 = vmatpush.bf16.msrb.mxu3 %v3530_v30  ;;  %v2830_v23 = vor.u32 %v3827_v10, %v2827_v11  ;;  %v3791_v25 = vld [vmem:[#allocation4 + $0x84] sm:$0xf]  ;;  %v2683_v26 = vld [vmem:[#allocation4 + $0x90] sm:$0xf0]  ;;  %v92_v54 = vperm.slane %v4233_v37, 7 }
  0x5a   :  { %1890 = vmatpush.bf16.msrb.mxu0 %v3130_v22  ;;  %v3823_v28 = vld [vmem:[#allocation4 + $0x184] sm:$0xf]  ;;  %v2811_v29 = vld [vmem:[#allocation4 + $0x190] sm:$0xf0]  ;;  %v2686_v35 = vor.u32 %v3791_v25, %v2683_v26 }
  0x5b   :  { %v3083_v42 = vld [vmem:[#allocation4 + $0x3b0] sm:$0xf0]  ;;  %v3787_v43 = vld [vmem:[#allocation4 + $0x64] sm:$0xf] }
  0x5c   :  { %1903 = vmatpush.bf16.msrb.mxu1 %v3258_v24  ;;  %1916 = vmatpush.bf16.msrb.mxu2 %v3386_v33  ;;  %v3099_v24 = vld [vmem:[#allocation4 + $0x3d0] sm:$0xf0]  ;;  %v3819_v46 = vld [vmem:[#allocation4 + $0x164] sm:$0xf] }
  0x5d   :  { %1929 = vmatpush.bf16.msrb.mxu3 %v3514_v36  ;;  %v3102_v34 = vor.u32 %v3895_v21, %v3099_v24  ;;  %v3859_v36 = vld [vmem:[#allocation4 + $0x2a4] sm:$0xf]  ;;  %v2667_v45 = vld [vmem:[#allocation4 + $0x70] sm:$0xf0] }
  0x5e   :  { %v3855_v55 = vld [vmem:[#allocation4 + $0x284] sm:$0xf]  ;;  %v2939_v57 = vld [vmem:[#allocation4 + $0x290] sm:$0xf0] }
  0x5f   :  { %v2651_v1 = vld [vmem:[#allocation4 + $0x50] sm:$0xf0]  ;;  %v3815_v2 = vld [vmem:[#allocation4 + $0x144] sm:$0xf] }
  0x60   :  { %v3851_v8 = vld [vmem:[#allocation4 + $0x264] sm:$0xf]  ;;  %v2635_v19 = vld [vmem:[#allocation4 + $0x30] sm:$0xf0] }
  0x61   :  { %v3883_v10 = vld [vmem:[#allocation4 + $0x364] sm:$0xf]  ;;  %v2763_v24 = vld [vmem:[#allocation4 + $0x130] sm:$0xf0] }
  0x96   :  { %v174_v40 = vpop.f32.mrf.mxu0 }
  0x97   :  { %v175_v41 = vadd.f32 %v174_v40, %v85_v38  ;;  %v187_v16 = vpop.f32.mrf.mxu1  ;;  %v2955_v38 = vld [vmem:[#allocation4 + $0x2b0] sm:$0xf0] }
  0x98   :  { %v188_v44 = vadd.f32 %v187_v16, %v86_v39  ;;  %v3891_v16 = vld [vmem:[#allocation4 + $0x3a4] sm:$0xf] }
  0x99   :  { %v269_v47 = vmax.f32 %v175_v41, 0.0  ;;  %v2814_v41 = vor.u32 %v3823_v28, %v2811_v29  ;;  %v3847_v29 = vld [vmem:[#allocation4 + $0x244] sm:$0xf] }
  0x9a   :  { %v270_v48 = vmax.f32 %v188_v44, 0.0 }
  0x9b   :  { %v4238_v51 = vpack.c.bf16 %v269_v47, %v269_v47  ;;  %v2795_v47 = vld [vmem:[#allocation4 + $0x170] sm:$0xf0] }
  0x9c   :  { %v4241_v56 = vpack.c.bf16 %v270_v48, %v270_v48 }
  0x9d   :  { %1839 = vmatmul.bf16.vlgmr.msra.gmra.mxu0 %v4238_v51 }
  0x9e   :  { %v200_v59 = vpop.f32.mrf.mxu2  ;;  %v213_v61 = vpop.f32.mrf.mxu3  ;;  %1852 = vmatmul.bf16.vlgmr.msra.gmra.mxu1 %v4241_v56  ;;  %1935 = vmatpush.bf16.msra.mxu0 %v2734_v50  ;;  %v91_v50 = vperm.slane %v4233_v37, 6  ;;  %v2942_v37 = vor.u32 %v3855_v55, %v2939_v57 }
  0x9f   :  { %v201_v60 = vadd.f32 %v200_v59, %v87_v49  ;;  %v176_v62 = vpop.f32.mrf.mxu0  ;;  %v214_v3 = vadd.f32 %v213_v61, %v88_v52  ;;  %1948 = vmatpush.bf16.msra.mxu1 %v2862_v53  ;;  %v189_v4 = vpop.f32.mrf.mxu1  ;;  %v2958_v49 = vor.u32 %v3859_v36, %v2955_v38  ;;  %v3086_v53 = vor.u32 %v3891_v16, %v3083_v42  ;;  %v3887_v61 = vld [vmem:[#allocation4 + $0x384] sm:$0xf]  ;;  %v2619_v38 = vld [vmem:[#allocation4 + $0x10] sm:$0xf0] }
  0xa0   :  { %v2670_v59 = vor.u32 %v3787_v43, %v2667_v45  ;;  %v3067_v62 = vld [vmem:[#allocation4 + $0x390] sm:$0xf0]  ;;  %v3775_v36 = vld [vmem:[#allocation4 + $0x4] sm:$0xf] }
  0xa1   :  { %v271_v9 = vmax.f32 %v201_v60, 0.0  ;;  %v272_v12 = vmax.f32 %v214_v3, 0.0  ;;  %v2798_v60 = vor.u32 %v3819_v46, %v2795_v47  ;;  %v2779_v3 = vld [vmem:[#allocation4 + $0x150] sm:$0xf0]  ;;  %v3070_v7 = vor.u32 %v3887_v61, %v3067_v62  ;;  %v3959_v62 = vld [vmem:[#allocation4 + $0x5c4] sm:$0xf] }
  0xa2   :  { %1936 = vmatpush.bf16.msra.mxu0 %v2718_v63  ;;  %v3783_v63 = vld [vmem:[#allocation4 + $0x44] sm:$0xf]  ;;  %v3243_v43 = vld [vmem:[#allocation4 + $0x4f0] sm:$0xf0] }
  0xa3   :  { %v4246_v15 = vpack.c.bf16 %v271_v9, %v271_v9  ;;  %v4248_v22 = vpack.c.bf16 %v272_v12, %v272_v12  ;;  %1949 = vmatpush.bf16.msra.mxu1 %v2846_v5  ;;  %v2923_v9 = vld [vmem:[#allocation4 + $0x270] sm:$0xf0] }
  0xa4   :  { %v2926_v26 = vor.u32 %v3851_v8, %v2923_v9  ;;  %v3371_v45 = vld [vmem:[#allocation4 + $0x5f0] sm:$0xf0]  ;;  %v4027_v9 = vld [vmem:[#allocation4 + $0x7e4] sm:$0xf] }
  0xa5   :  { %1865 = vmatmul.bf16.vlgmr.msra.gmra.mxu2 %v4246_v15  ;;  %1878 = vmatmul.bf16.vlgmr.msra.gmra.mxu3 %v4248_v22  ;;  %v3227_v61 = vld [vmem:[#allocation4 + $0x4d0] sm:$0xf0] }
  0xa6   :  { %1961 = vmatpush.bf16.msra.mxu2 %v2990_v13  ;;  %v202_v30 = vpop.f32.mrf.mxu2  ;;  %1974 = vmatpush.bf16.msra.mxu3 %v3118_v17  ;;  %v215_v32 = vpop.f32.mrf.mxu3  ;;  %v2654_v13 = vor.u32 %v3783_v63, %v2651_v1  ;;  %v3051_v17 = vld [vmem:[#allocation4 + $0x370] sm:$0xf0] }
  0xa7   :  { %1937 = vmatpush.bf16.msra.mxu0 %v2702_v18  ;;  %v226_v33 = vpop.f32.mrf.mxu0  ;;  %1950 = vmatpush.bf16.msra.mxu1 %v2830_v23  ;;  %v239_v40 = vpop.f32.mrf.mxu1  ;;  %v3779_v18 = vld [vmem:[#allocation4 + $0x24] sm:$0xf]  ;;  %v3054_v28 = vor.u32 %v3883_v10, %v3051_v17  ;;  %v2907_v30 = vld [vmem:[#allocation4 + $0x250] sm:$0xf0] }
  0xa8   :  { %v227_v39 = vadd.f32 %v226_v33, %v89_v14  ;;  %v240_v44 = vadd.f32 %v239_v40, %v90_v27  ;;  %v2782_v14 = vor.u32 %v3815_v2, %v2779_v3  ;;  %v3811_v23 = vld [vmem:[#allocation4 + $0x124] sm:$0xf]  ;;  %v2638_v33 = vor.u32 %v3779_v18, %v2635_v19  ;;  %v2747_v40 = vld [vmem:[#allocation4 + $0x110] sm:$0xf0] }
  0xa9   :  { %v2910_v16 = vor.u32 %v3847_v29, %v2907_v30  ;;  %v3355_v63 = vld [vmem:[#allocation4 + $0x5d0] sm:$0xf0]  ;;  %v3839_v2 = vld [vmem:[#allocation4 + $0x204] sm:$0xf] }
  0xaa   :  { %v273_v48 = vmax.f32 %v227_v39, 0.0  ;;  %1962 = vmatpush.bf16.msra.mxu2 %v2974_v31  ;;  %v274_v52 = vmax.f32 %v240_v44, 0.0  ;;  %1975 = vmatpush.bf16.msra.mxu3 %v3102_v34  ;;  %v3879_v31 = vld [vmem:[#allocation4 + $0x344] sm:$0xf]  ;;  %v2766_v34 = vor.u32 %v3811_v23, %v2763_v24  ;;  %v2875_v3 = vld [vmem:[#allocation4 + $0x210] sm:$0xf0]  ;;  %v3358_v8 = vor.u32 %v3959_v62, %v3355_v63 }
  0xab   :  { %1938 = vmatpush.bf16.msra.mxu0 %v2686_v35  ;;  %1951 = vmatpush.bf16.msra.mxu1 %v2814_v41  ;;  %v3035_v35 = vld [vmem:[#allocation4 + $0x350] sm:$0xf0]  ;;  %v3807_v39 = vld [vmem:[#allocation4 + $0x104] sm:$0xf] }
  0xac   :  { %v4255_v58 = vpack.c.bf16 %v273_v48, %v273_v48  ;;  %v4257_v0 = vpack.c.bf16 %v274_v52, %v274_v52  ;;  %v3931_v41 = vld [vmem:[#allocation4 + $0x4e4] sm:$0xf]  ;;  %v3038_v46 = vor.u32 %v3879_v31, %v3035_v35  ;;  %v2750_v52 = vor.u32 %v3807_v39, %v2747_v40  ;;  %v3627_v10 = vld [vmem:[#allocation4 + $0x7f0] sm:$0xf0] }
  0xad   :  { %v3963_v44 = vld [vmem:[#allocation4 + $0x5e4] sm:$0xf]  ;;  %v3246_v55 = vor.u32 %v3931_v41, %v3243_v43  ;;  %v3339_v17 = vld [vmem:[#allocation4 + $0x5b0] sm:$0xf0] }
  0xae   :  { %1963 = vmatpush.bf16.msra.mxu2 %v2958_v49  ;;  %v252_v4 = vpop.f32.mrf.mxu2  ;;  %1891 = vmatmul.bf16.vlgmr.msrb.gmra.mxu0 %v4255_v58  ;;  %v265_v6 = vpop.f32.mrf.mxu3  ;;  %v3843_v48 = vld [vmem:[#allocation4 + $0x224] sm:$0xf]  ;;  %v2891_v49 = vld [vmem:[#allocation4 + $0x230] sm:$0xf0]  ;;  %v3374_v57 = vor.u32 %v3963_v44, %v3371_v45 }
  0xaf   :  { %1976 = vmatpush.bf16.msra.mxu3 %v3086_v53  ;;  %v253_v5 = vadd.f32 %v252_v4, %v91_v50  ;;  %1904 = vmatmul.bf16.vlgmr.msrb.gmra.mxu1 %v4257_v0  ;;  %v228_v11 = vpop.f32.mrf.mxu0  ;;  %v266_v12 = vadd.f32 %v265_v6, %v92_v54  ;;  %v241_v20 = vpop.f32.mrf.mxu1  ;;  %v2622_v50 = vor.u32 %v3775_v36, %v2619_v38  ;;  %v3875_v53 = vld [vmem:[#allocation4 + $0x324] sm:$0xf]  ;;  %v3019_v54 = vld [vmem:[#allocation4 + $0x330] sm:$0xf0] }
  0xb0   :  { %1939 = vmatpush.bf16.msra.mxu0 %v2670_v59  ;;  %1952 = vmatpush.bf16.msra.mxu1 %v2798_v60  ;;  %v3927_v59 = vld [vmem:[#allocation4 + $0x4c4] sm:$0xf]  ;;  %v2894_v60 = vor.u32 %v3843_v48, %v2891_v49  ;;  %v3022_v1 = vor.u32 %v3875_v53, %v3019_v54  ;;  %v3499_v6 = vld [vmem:[#allocation4 + $0x6f0] sm:$0xf0]  ;;  %v3630_v20 = vor.u32 %v4027_v9, %v3627_v10 }
  0xb1   :  { %v275_v21 = vmax.f32 %v253_v5, 0.0  ;;  %v276_v25 = vmax.f32 %v266_v12, 0.0  ;;  %v3871_v4 = vld [vmem:[#allocation4 + $0x304] sm:$0xf]  ;;  %v2878_v12 = vor.u32 %v3839_v2, %v2875_v3  ;;  %v3483_v23 = vld [vmem:[#allocation4 + $0x6d0] sm:$0xf0] }
  0xb2   :  { %1964 = vmatpush.bf16.msra.mxu2 %v2942_v37  ;;  %v3003_v37 = vld [vmem:[#allocation4 + $0x310] sm:$0xf0]  ;;  %v3995_v5 = vld [vmem:[#allocation4 + $0x6e4] sm:$0xf] }
  0xb3   :  { %v4261_v27 = vpack.c.bf16 %v275_v21, %v275_v21  ;;  %1977 = vmatpush.bf16.msra.mxu3 %v3070_v7  ;;  %v4263_v32 = vpack.c.bf16 %v276_v25, %v276_v25  ;;  %v3230_v7 = vor.u32 %v3927_v59, %v3227_v61  ;;  %v3923_v11 = vld [vmem:[#allocation4 + $0x4a4] sm:$0xf]  ;;  %v3006_v18 = vor.u32 %v3871_v4, %v3003_v37  ;;  %v3195_v30 = vld [vmem:[#allocation4 + $0x490] sm:$0xf0] }
  0xb4   :  { %1940 = vmatpush.bf16.msra.mxu0 %v2654_v13  ;;  %1953 = vmatpush.bf16.msra.mxu1 %v2782_v14  ;;  %v3211_v13 = vld [vmem:[#allocation4 + $0x4b0] sm:$0xf0]  ;;  %v3955_v14 = vld [vmem:[#allocation4 + $0x5a4] sm:$0xf]  ;;  %v3502_v19 = vor.u32 %v3995_v5, %v3499_v6 }
  0xb5   :  { %1917 = vmatmul.bf16.vlgmr.msrb.gmra.mxu2 %v4261_v27  ;;  %1930 = vmatmul.bf16.vlgmr.msrb.gmra.mxu3 %v4263_v32  ;;  %v3991_v21 = vld [vmem:[#allocation4 + $0x6c4] sm:$0xf]  ;;  %v3214_v24 = vor.u32 %v3923_v11, %v3211_v13  ;;  %v3342_v25 = vor.u32 %v3955_v14, %v3339_v17  ;;  %v3467_v38 = vld [vmem:[#allocation4 + $0x6b0] sm:$0xf0] }
  0xb6   :  { %1965 = vmatpush.bf16.msra.mxu2 %v2926_v26  ;;  %v254_v42 = vpop.f32.mrf.mxu2  ;;  %v267_v47 = vpop.f32.mrf.mxu3  ;;  %v4023_v26 = vld [vmem:[#allocation4 + $0x7c4] sm:$0xf]  ;;  %v3179_v43 = vld [vmem:[#allocation4 + $0x470] sm:$0xf0] }
  0xb7   :  { %1978 = vmatpush.bf16.msra.mxu3 %v3054_v28  ;;  %v3611_v28 = vld [vmem:[#allocation4 + $0x7d0] sm:$0xf0]  ;;  %v3919_v29 = vld [vmem:[#allocation4 + $0x484] sm:$0xf] }
  0xb8   :  { %1941 = vmatpush.bf16.msra.mxu0 %v2638_v33  ;;  %1954 = vmatpush.bf16.msra.mxu1 %v2766_v34  ;;  %v3951_v31 = vld [vmem:[#allocation4 + $0x584] sm:$0xf]  ;;  %v3323_v33 = vld [vmem:[#allocation4 + $0x590] sm:$0xf0]  ;;  %v3486_v34 = vor.u32 %v3991_v21, %v3483_v23  ;;  %v3614_v35 = vor.u32 %v4023_v26, %v3611_v28  ;;  %v3198_v39 = vor.u32 %v3919_v29, %v3195_v30  ;;  %v3806_v26 = vld [vmem:[#allocation4 + $0xf4] sm:$0xf0] }
  0xb9   :  { %v3987_v36 = vld [vmem:[#allocation4 + $0x6a4] sm:$0xf]  ;;  %v3326_v40 = vor.u32 %v3951_v31, %v3323_v33  ;;  %v3307_v45 = vld [vmem:[#allocation4 + $0x570] sm:$0xf0]  ;;  %v2865_v28 = vld [vmem:[#allocation4 + $0x1e8] sm:$0xf] }
  0xba   :  { %1966 = vmatpush.bf16.msra.mxu2 %v2910_v16  ;;  %v4019_v41 = vld [vmem:[#allocation4 + $0x7a4] sm:$0xf]  ;;  %v3595_v16 = vld [vmem:[#allocation4 + $0x7b0] sm:$0xf0]  ;;  %v3838_v29 = vld [vmem:[#allocation4 + $0x1f4] sm:$0xf0] }
  0xbb   :  { %1979 = vmatpush.bf16.msra.mxu3 %v3038_v46  ;;  %v3915_v42 = vld [vmem:[#allocation4 + $0x464] sm:$0xf]  ;;  %v3470_v46 = vor.u32 %v3987_v36, %v3467_v38  ;;  %v3598_v47 = vor.u32 %v4019_v41, %v3595_v16  ;;  %v3451_v49 = vld [vmem:[#allocation4 + $0x690] sm:$0xf0]  ;;  %v2721_v41 = vld [vmem:[#allocation4 + $0xc8] sm:$0xf] }
  0xbc   :  { %1942 = vmatpush.bf16.msra.mxu0 %v2622_v50  ;;  %1955 = vmatpush.bf16.msra.mxu1 %v2750_v52  ;;  %v3947_v44 = vld [vmem:[#allocation4 + $0x564] sm:$0xf]  ;;  %v3182_v50 = vor.u32 %v3915_v42, %v3179_v43  ;;  %v3579_v54 = vld [vmem:[#allocation4 + $0x790] sm:$0xf0]  ;;  %v3802_v42 = vld [vmem:[#allocation4 + $0xd4] sm:$0xf0] }
  0xbd   :  { %v3983_v48 = vld [vmem:[#allocation4 + $0x684] sm:$0xf]  ;;  %v3310_v52 = vor.u32 %v3947_v44, %v3307_v45  ;;  %v3563_v37 = vld [vmem:[#allocation4 + $0x770] sm:$0xf0]  ;;  %v2849_v43 = vld [vmem:[#allocation4 + $0x1c8] sm:$0xf] }
  0xbe   :  { %1967 = vmatpush.bf16.msra.mxu2 %v2894_v60  ;;  %v4015_v53 = vld [vmem:[#allocation4 + $0x784] sm:$0xf]  ;;  %v3291_v60 = vld [vmem:[#allocation4 + $0x550] sm:$0xf0]  ;;  %v3454_v61 = vor.u32 %v3983_v48, %v3451_v49  ;;  %v3834_v44 = vld [vmem:[#allocation4 + $0x1d4] sm:$0xf0] }
  0xbf   :  { %1980 = vmatpush.bf16.msra.mxu3 %v3022_v1  ;;  %1943 = vmatmul.bf16.vlgmr.msra.gmra.mxu0 %v4238_v51  ;;  %v3943_v59 = vld [vmem:[#allocation4 + $0x544] sm:$0xf]  ;;  %v3582_v62 = vor.u32 %v4015_v53, %v3579_v54  ;;  %v3435_v1 = vld [vmem:[#allocation4 + $0x670] sm:$0xf0]  ;;  %v2722_v53 = vor.u32 %v3802_v42, %v2721_v41  ;;  %v2850_v54 = vor.u32 %v3834_v44, %v2849_v43  ;;  %v3818_v42 = vld [vmem:[#allocation4 + $0x154] sm:$0xf0] }
  0xc0   :  { %1987 = vmatpush.bf16.msrb.mxu0 %v3246_v55  ;;  %2000 = vmatpush.bf16.msrb.mxu1 %v3374_v57  ;;  %v3911_v55 = vld [vmem:[#allocation4 + $0x444] sm:$0xf]  ;;  %v3163_v57 = vld [vmem:[#allocation4 + $0x450] sm:$0xf0]  ;;  %v3294_v3 = vor.u32 %v3943_v59, %v3291_v60  ;;  %v2705_v60 = vld [vmem:[#allocation4 + $0xa8] sm:$0xf] }
  0xc1   :  { %1956 = vmatmul.bf16.vlgmr.msra.gmra.mxu1 %v4241_v56  ;;  %v3979_v63 = vld [vmem:[#allocation4 + $0x664] sm:$0xf]  ;;  %v3166_v2 = vor.u32 %v3911_v55, %v3163_v57  ;;  %v3147_v6 = vld [vmem:[#allocation4 + $0x430] sm:$0xf0]  ;;  %v3121_v55 = vld [vmem:[#allocation4 + $0x3e8] sm:$0xf] }
  0xc2   :  { %1968 = vmatpush.bf16.msra.mxu2 %v2878_v12  ;;  %v4011_v4 = vld [vmem:[#allocation4 + $0x764] sm:$0xf]  ;;  %v3438_v9 = vor.u32 %v3979_v63, %v3435_v1  ;;  %v3419_v12 = vld [vmem:[#allocation4 + $0x650] sm:$0xf0]  ;;  %v3902_v57 = vld [vmem:[#allocation4 + $0x3f4] sm:$0xf0] }
  0xc3   :  { %1981 = vmatpush.bf16.msra.mxu3 %v3006_v18  ;;  %v3907_v5 = vld [vmem:[#allocation4 + $0x424] sm:$0xf]  ;;  %v3566_v10 = vor.u32 %v4011_v4, %v3563_v37  ;;  %v3547_v18 = vld [vmem:[#allocation4 + $0x750] sm:$0xf0]  ;;  %v2833_v1 = vld [vmem:[#allocation4 + $0x1a8] sm:$0xf] }
  0xc4   :  { %1988 = vmatpush.bf16.msrb.mxu0 %v3230_v7  ;;  %2001 = vmatpush.bf16.msrb.mxu1 %v3358_v8  ;;  %v3939_v7 = vld [vmem:[#allocation4 + $0x524] sm:$0xf]  ;;  %v3275_v8 = vld [vmem:[#allocation4 + $0x530] sm:$0xf0]  ;;  %v3150_v14 = vor.u32 %v3907_v5, %v3147_v6  ;;  %v2977_v4 = vld [vmem:[#allocation4 + $0x2c8] sm:$0xf] }
  0xc5   :  { %1969 = vmatmul.bf16.vlgmr.msra.gmra.mxu2 %v4246_v15  ;;  %v3975_v11 = vld [vmem:[#allocation4 + $0x644] sm:$0xf]  ;;  %v3278_v17 = vor.u32 %v3939_v7, %v3275_v8  ;;  %v3259_v23 = vld [vmem:[#allocation4 + $0x510] sm:$0xf0]  ;;  %v3866_v37 = vld [vmem:[#allocation4 + $0x2d4] sm:$0xf0] }
  0xc6   :  { %2013 = vmatpush.bf16.msrb.mxu2 %v3502_v19  ;;  %1982 = vmatmul.bf16.vlgmr.msra.gmra.mxu3 %v4248_v22  ;;  %v4007_v13 = vld [vmem:[#allocation4 + $0x744] sm:$0xf]  ;;  %v3403_v33 = vld [vmem:[#allocation4 + $0x630] sm:$0xf0]  ;;  %v3105_v6 = vld [vmem:[#allocation4 + $0x3c8] sm:$0xf] }
  0xc7   :  { %2026 = vmatpush.bf16.msrb.mxu3 %v3630_v20  ;;  %v3903_v19 = vld [vmem:[#allocation4 + $0x404] sm:$0xf]  ;;  %v3131_v20 = vld [vmem:[#allocation4 + $0x410] sm:$0xf0]  ;;  %v3550_v30 = vor.u32 %v4007_v13, %v3547_v18  ;;  %v3898_v7 = vld [vmem:[#allocation4 + $0x3d4] sm:$0xf0] }
  0xc8   :  { %1989 = vmatpush.bf16.msrb.mxu0 %v3214_v24  ;;  %2002 = vmatpush.bf16.msrb.mxu1 %v3342_v25  ;;  %v3935_v21 = vld [vmem:[#allocation4 + $0x504] sm:$0xf]  ;;  %v2737_v24 = vld [vmem:[#allocation4 + $0xe8] sm:$0xf]  ;;  %v3422_v25 = vor.u32 %v3975_v11, %v3419_v12  ;;  %v3531_v38 = vld [vmem:[#allocation4 + $0x730] sm:$0xf0]  ;;  %v2978_v11 = vor.u32 %v3866_v37, %v2977_v4 }
  0xc9   :  { %v3971_v31 = vld [vmem:[#allocation4 + $0x624] sm:$0xf]  ;;  %v3515_v49 = vld [vmem:[#allocation4 + $0x710] sm:$0xf0]  ;;  %v2817_v12 = vld [vmem:[#allocation4 + $0x188] sm:$0xf] }
  0xca   :  { %2014 = vmatpush.bf16.msrb.mxu2 %v3486_v34  ;;  %v3134_v34 = vor.u32 %v3903_v19, %v3131_v20  ;;  %v4003_v36 = vld [vmem:[#allocation4 + $0x724] sm:$0xf]  ;;  %v3406_v16 = vor.u32 %v3971_v31, %v3403_v33  ;;  %v3826_v13 = vld [vmem:[#allocation4 + $0x194] sm:$0xf0]  ;;  %v3089_v20 = vld [vmem:[#allocation4 + $0x3a8] sm:$0xf] }
  0xcb   :  { %2027 = vmatpush.bf16.msrb.mxu3 %v3614_v35  ;;  %v3262_v35 = vor.u32 %v3935_v21, %v3259_v23  ;;  %v3534_v45 = vor.u32 %v4003_v36, %v3531_v38  ;;  %v3999_v48 = vld [vmem:[#allocation4 + $0x704] sm:$0xf]  ;;  %v3862_v18 = vld [vmem:[#allocation4 + $0x2b4] sm:$0xf0]  ;;  %v2818_v23 = vor.u32 %v3826_v13, %v2817_v12  ;;  %v2945_v31 = vld [vmem:[#allocation4 + $0x288] sm:$0xf] }
  0xcc   :  { %1990 = vmatpush.bf16.msrb.mxu0 %v3198_v39  ;;  %2003 = vmatpush.bf16.msrb.mxu1 %v3326_v40  ;;  %v2738_v39 = vor.u32 %v3806_v26, %v2737_v24  ;;  %v2866_v40 = vor.u32 %v3838_v29, %v2865_v28  ;;  %v3894_v21 = vld [vmem:[#allocation4 + $0x3b4] sm:$0xf0]  ;;  %v2673_v24 = vld [vmem:[#allocation4 + $0x68] sm:$0xf] }
  0xcd   :  { %v2801_v28 = vld [vmem:[#allocation4 + $0x168] sm:$0xf]  ;;  %v3822_v29 = vld [vmem:[#allocation4 + $0x174] sm:$0xf0] }
  0xce   :  { %2015 = vmatpush.bf16.msrb.mxu2 %v3470_v46  ;;  %v3967_v46 = vld [vmem:[#allocation4 + $0x604] sm:$0xf]  ;;  %v3858_v33 = vld [vmem:[#allocation4 + $0x294] sm:$0xf0]  ;;  %v2802_v38 = vor.u32 %v3822_v29, %v2801_v28  ;;  %v2929_v44 = vld [vmem:[#allocation4 + $0x268] sm:$0xf] }
  0xcf   :  { %2028 = vmatpush.bf16.msrb.mxu3 %v3598_v47  ;;  %v3387_v47 = vld [vmem:[#allocation4 + $0x610] sm:$0xf0]  ;;  %v3890_v36 = vld [vmem:[#allocation4 + $0x394] sm:$0xf0]  ;;  %v2946_v41 = vor.u32 %v3858_v33, %v2945_v31  ;;  %v2753_v4 = vld [vmem:[#allocation4 + $0x108] sm:$0xf] }
  0xd0   :  { %1991 = vmatpush.bf16.msrb.mxu0 %v3182_v50  ;;  %2004 = vmatpush.bf16.msrb.mxu1 %v3310_v52  ;;  %v2993_v50 = vld [vmem:[#allocation4 + $0x2e8] sm:$0xf]  ;;  %v3870_v52 = vld [vmem:[#allocation4 + $0x2f4] sm:$0xf0]  ;;  %v3390_v59 = vor.u32 %v3967_v46, %v3387_v47 }
  0xd1   :  { %v2994_v63 = vor.u32 %v3870_v52, %v2993_v50  ;;  %v3057_v47 = vld [vmem:[#allocation4 + $0x368] sm:$0xf]  ;;  %v3782_v52 = vld [vmem:[#allocation4 + $0x34] sm:$0xf0] }
  0xd2   :  { %2016 = vmatpush.bf16.msrb.mxu2 %v3454_v61  ;;  %v3798_v61 = vld [vmem:[#allocation4 + $0xb4] sm:$0xf0]  ;;  %v2641_v50 = vld [vmem:[#allocation4 + $0x28] sm:$0xf] }
  0xd3   :  { %2029 = vmatpush.bf16.msrb.mxu3 %v3582_v62  ;;  %v3518_v62 = vor.u32 %v3999_v48, %v3515_v49  ;;  %v2706_v5 = vor.u32 %v3798_v61, %v2705_v60  ;;  %v3886_v48 = vld [vmem:[#allocation4 + $0x374] sm:$0xf0]  ;;  %v2642_v61 = vor.u32 %v3782_v52, %v2641_v50  ;;  %v2881_v29 = vld [vmem:[#allocation4 + $0x208] sm:$0xf] }
  0xd4   :  { %1992 = vmatpush.bf16.msrb.mxu0 %v3166_v2  ;;  %2005 = vmatpush.bf16.msrb.mxu1 %v3294_v3  ;;  %v3830_v2 = vld [vmem:[#allocation4 + $0x1b4] sm:$0xf0]  ;;  %v3122_v3 = vor.u32 %v3902_v57, %v3121_v55  ;;  %v3058_v57 = vor.u32 %v3886_v48, %v3057_v47  ;;  %v3009_v31 = vld [vmem:[#allocation4 + $0x308] sm:$0xf] }
  0xd5   :  { %v2834_v8 = vor.u32 %v3830_v2, %v2833_v1  ;;  %v3814_v55 = vld [vmem:[#allocation4 + $0x134] sm:$0xf0]  ;;  %v2625_v1 = vld [vmem:[#allocation4 + $0x8] sm:$0xf] }
  0xd6   :  { %2017 = vmatpush.bf16.msrb.mxu2 %v3438_v9  ;;  %v2689_v9 = vld [vmem:[#allocation4 + $0x88] sm:$0xf]  ;;  %v3850_v60 = vld [vmem:[#allocation4 + $0x254] sm:$0xf0] }
  0xd7   :  { %2030 = vmatpush.bf16.msrb.mxu3 %v3566_v10  ;;  %v3794_v10 = vld [vmem:[#allocation4 + $0x94] sm:$0xf0]  ;;  %v3489_v48 = vld [vmem:[#allocation4 + $0x6c8] sm:$0xf] }
  0xd8   :  { %1993 = vmatpush.bf16.msrb.mxu0 %v3150_v14  ;;  %2006 = vmatpush.bf16.msrb.mxu1 %v3278_v17  ;;  %v3106_v14 = vor.u32 %v3898_v7, %v3105_v6  ;;  %v2961_v17 = vld [vmem:[#allocation4 + $0x2a8] sm:$0xf]  ;;  %v2690_v19 = vor.u32 %v3794_v10, %v2689_v9  ;;  %v3810_v37 = vld [vmem:[#allocation4 + $0x114] sm:$0xf0] }
  0xd9   :  { %v2962_v26 = vor.u32 %v3862_v18, %v2961_v17  ;;  %v3249_v6 = vld [vmem:[#allocation4 + $0x4e8] sm:$0xf]  ;;  %v3934_v7 = vld [vmem:[#allocation4 + $0x4f4] sm:$0xf0]  ;;  %v2754_v18 = vor.u32 %v3810_v37, %v2753_v4 }
  0xda   :  { %2018 = vmatpush.bf16.msrb.mxu2 %v3422_v25  ;;  %v3790_v25 = vld [vmem:[#allocation4 + $0x74] sm:$0xf0]  ;;  %v3617_v52 = vld [vmem:[#allocation4 + $0x7c8] sm:$0xf] }
  0xdb   :  { %2031 = vmatpush.bf16.msrb.mxu3 %v3550_v30  ;;  %v3090_v30 = vor.u32 %v3894_v21, %v3089_v20  ;;  %v3966_v10 = vld [vmem:[#allocation4 + $0x5f4] sm:$0xf0]  ;;  %v3233_v20 = vld [vmem:[#allocation4 + $0x4c8] sm:$0xf] }
  0xdc   :  { %1994 = vmatpush.bf16.msrb.mxu0 %v3134_v34  ;;  %2007 = vmatpush.bf16.msrb.mxu1 %v3262_v35  ;;  %v2674_v34 = vor.u32 %v3790_v25, %v2673_v24  ;;  %v3073_v35 = vld [vmem:[#allocation4 + $0x388] sm:$0xf]  ;;  %v3846_v12 = vld [vmem:[#allocation4 + $0x234] sm:$0xf0] }
  0xdd   :  { %v3074_v43 = vor.u32 %v3890_v36, %v3073_v35  ;;  %v3878_v17 = vld [vmem:[#allocation4 + $0x334] sm:$0xf0]  ;;  %v3361_v25 = vld [vmem:[#allocation4 + $0x5c8] sm:$0xf] }
  0xde   :  { %2019 = vmatpush.bf16.msrb.mxu2 %v3406_v16  ;;  %v2785_v16 = vld [vmem:[#allocation4 + $0x148] sm:$0xf]  ;;  %v3930_v24 = vld [vmem:[#allocation4 + $0x4d4] sm:$0xf0] }
  0xdf   :  { %2032 = vmatpush.bf16.msrb.mxu3 %v3534_v45  ;;  %1995 = vmatmul.bf16.vlgmr.msrb.gmra.mxu0 %v4255_v58  ;;  %v3854_v45 = vld [vmem:[#allocation4 + $0x274] sm:$0xf0]  ;;  %v2786_v49 = vor.u32 %v3818_v42, %v2785_v16  ;;  %v3234_v36 = vor.u32 %v3930_v24, %v3233_v20  ;;  %v3217_v16 = vld [vmem:[#allocation4 + $0x4a8] sm:$0xf] }
  0xe0   :  { %2039 = vmatpush.bf16.msra.mxu0 %v2738_v39  ;;  %2052 = vmatpush.bf16.msra.mxu1 %v2866_v40  ;;  %v2657_v39 = vld [vmem:[#allocation4 + $0x48] sm:$0xf]  ;;  %v3786_v40 = vld [vmem:[#allocation4 + $0x54] sm:$0xf0] }
  0xe1   :  { %2008 = vmatmul.bf16.vlgmr.msrb.gmra.mxu1 %v4257_v0  ;;  %v2658_v46 = vor.u32 %v3786_v40, %v2657_v39  ;;  %v3874_v33 = vld [vmem:[#allocation4 + $0x314] sm:$0xf0] }
  0xe2   :  { %2020 = vmatpush.bf16.msrb.mxu2 %v3390_v59  ;;  %v2913_v59 = vld [vmem:[#allocation4 + $0x248] sm:$0xf]  ;;  %v3998_v35 = vld [vmem:[#allocation4 + $0x6f4] sm:$0xf0] }
  0xe3   :  { %2033 = vmatpush.bf16.msrb.mxu3 %v3518_v62  ;;  %v3041_v62 = vld [vmem:[#allocation4 + $0x348] sm:$0xf]  ;;  %v4030_v39 = vld [vmem:[#allocation4 + $0x7f4] sm:$0xf0] }
  0xe4   :  { %2040 = vmatpush.bf16.msra.mxu0 %v2722_v53  ;;  %2053 = vmatpush.bf16.msra.mxu1 %v2850_v54  ;;  %v2930_v53 = vor.u32 %v3854_v45, %v2929_v44  ;;  %v2769_v54 = vld [vmem:[#allocation4 + $0x128] sm:$0xf]  ;;  %v3926_v42 = vld [vmem:[#allocation4 + $0x4b4] sm:$0xf0] }
  0xe5   :  { %2021 = vmatmul.bf16.vlgmr.msrb.gmra.mxu2 %v4261_v27  ;;  %v2770_v2 = vor.u32 %v3814_v55, %v2769_v54  ;;  %v3345_v45 = vld [vmem:[#allocation4 + $0x5a8] sm:$0xf]  ;;  %v3218_v50 = vor.u32 %v3926_v42, %v3217_v16  ;;  %v4022_v4 = vld [vmem:[#allocation4 + $0x7b4] sm:$0xf0] }
  0xe6   :  { %2065 = vmatpush.bf16.msra.mxu2 %v2994_v63  ;;  %2034 = vmatmul.bf16.vlgmr.msrb.gmra.mxu3 %v4263_v32  ;;  %v3882_v63 = vld [vmem:[#allocation4 + $0x354] sm:$0xf0]  ;;  %v3201_v55 = vld [vmem:[#allocation4 + $0x488] sm:$0xf] }
  0xe7   :  { %2078 = vmatpush.bf16.msra.mxu3 %v3122_v3  ;;  %v3778_v3 = vld [vmem:[#allocation4 + $0x14] sm:$0xf0]  ;;  %v3042_v9 = vor.u32 %v3882_v63, %v3041_v62  ;;  %v3473_v63 = vld [vmem:[#allocation4 + $0x6a8] sm:$0xf] }
  0xe8   :  { %2041 = vmatpush.bf16.msra.mxu0 %v2706_v5  ;;  %2054 = vmatpush.bf16.msra.mxu1 %v2834_v8  ;;  %v2914_v5 = vor.u32 %v3850_v60, %v2913_v59  ;;  %v3377_v8 = vld [vmem:[#allocation4 + $0x5e8] sm:$0xf]  ;;  %v2626_v13 = vor.u32 %v3778_v3, %v2625_v1  ;;  %v3990_v1 = vld [vmem:[#allocation4 + $0x6b4] sm:$0xf0] }
  0xe9   :  { %v3378_v21 = vor.u32 %v3966_v10, %v3377_v8  ;;  %v3329_v60 = vld [vmem:[#allocation4 + $0x588] sm:$0xf]  ;;  %v3914_v20 = vld [vmem:[#allocation4 + $0x454] sm:$0xf0] }
  0xea   :  { %2066 = vmatpush.bf16.msra.mxu2 %v2978_v11  ;;  %v2897_v11 = vld [vmem:[#allocation4 + $0x228] sm:$0xf]  ;;  %v3946_v24 = vld [vmem:[#allocation4 + $0x554] sm:$0xf0] }
  0xeb   :  { %2079 = vmatpush.bf16.msra.mxu3 %v3106_v14  ;;  %v3025_v14 = vld [vmem:[#allocation4 + $0x328] sm:$0xf]  ;;  %v3978_v16 = vld [vmem:[#allocation4 + $0x654] sm:$0xf0] }
  0xec   :  { %2042 = vmatpush.bf16.msra.mxu0 %v2690_v19  ;;  %2055 = vmatpush.bf16.msra.mxu1 %v2818_v23  ;;  %v3250_v19 = vor.u32 %v3934_v7, %v3249_v6  ;;  %v2898_v23 = vor.u32 %v3846_v12, %v2897_v11  ;;  %v3026_v28 = vor.u32 %v3878_v17, %v3025_v14  ;;  %v3601_v3 = vld [vmem:[#allocation4 + $0x7a8] sm:$0xf]  ;;  %v3918_v6 = vld [vmem:[#allocation4 + $0x474] sm:$0xf0] }
  0xed   :  { %v3474_v7 = vor.u32 %v3990_v1, %v3473_v63  ;;  %v3313_v8 = vld [vmem:[#allocation4 + $0x568] sm:$0xf]  ;;  %v3602_v10 = vor.u32 %v4022_v4, %v3601_v3  ;;  %v3986_v12 = vld [vmem:[#allocation4 + $0x694] sm:$0xf0]  ;;  %v3800_v3 = vld [vmem:[#allocation4 + $0xcc] sm:$0xf] }
  0xee   :  { %2067 = vmatpush.bf16.msra.mxu2 %v2962_v26  ;;  %v3962_v26 = vld [vmem:[#allocation4 + $0x5d4] sm:$0xf0]  ;;  %v3457_v11 = vld [vmem:[#allocation4 + $0x688] sm:$0xf] }
  0xef   :  { %2080 = vmatpush.bf16.msra.mxu3 %v3090_v30  ;;  %v3842_v30 = vld [vmem:[#allocation4 + $0x214] sm:$0xf0]  ;;  %v3362_v40 = vor.u32 %v3962_v26, %v3361_v25  ;;  %v3585_v14 = vld [vmem:[#allocation4 + $0x788] sm:$0xf] }
  0xf0   :  { %2043 = vmatpush.bf16.msra.mxu0 %v2674_v34  ;;  %2056 = vmatpush.bf16.msra.mxu1 %v2802_v38  ;;  %v3505_v34 = vld [vmem:[#allocation4 + $0x6e8] sm:$0xf]  ;;  %v4018_v17 = vld [vmem:[#allocation4 + $0x794] sm:$0xf0] }
  0xf1   :  { %v3633_v38 = vld [vmem:[#allocation4 + $0x7e8] sm:$0xf]  ;;  %v3506_v44 = vor.u32 %v3998_v35, %v3505_v34  ;;  %v3586_v25 = vor.u32 %v4018_v17, %v3585_v14  ;;  %v3910_v35 = vld [vmem:[#allocation4 + $0x434] sm:$0xf0]  ;;  %v2995_v14 = vld [vmem:[#allocation4 + $0x2f8] sm:$0xf0] }
  0xf2   :  { %2068 = vmatpush.bf16.msra.mxu2 %v2946_v41  ;;  %v2882_v41 = vor.u32 %v3842_v30, %v2881_v29  ;;  %v3634_v47 = vor.u32 %v4030_v39, %v3633_v38  ;;  %v3441_v26 = vld [vmem:[#allocation4 + $0x668] sm:$0xf]  ;;  %v3942_v39 = vld [vmem:[#allocation4 + $0x534] sm:$0xf0] }
  0xf3   :  { %2081 = vmatpush.bf16.msra.mxu3 %v3074_v43  ;;  %v3010_v43 = vor.u32 %v3874_v33, %v3009_v31  ;;  %v3569_v30 = vld [vmem:[#allocation4 + $0x768] sm:$0xf]  ;;  %v4014_v31 = vld [vmem:[#allocation4 + $0x774] sm:$0xf0] }
  0xf4   :  { %2044 = vmatpush.bf16.msra.mxu0 %v2658_v46  ;;  %2057 = vmatpush.bf16.msra.mxu1 %v2786_v49  ;;  %v3958_v46 = vld [vmem:[#allocation4 + $0x5b4] sm:$0xf0]  ;;  %v3153_v34 = vld [vmem:[#allocation4 + $0x428] sm:$0xf] }
  0xf5   :  { %v3994_v49 = vld [vmem:[#allocation4 + $0x6d4] sm:$0xf0]  ;;  %v3346_v54 = vor.u32 %v3958_v46, %v3345_v45  ;;  %v3281_v38 = vld [vmem:[#allocation4 + $0x528] sm:$0xf]  ;;  %v3154_v42 = vor.u32 %v3910_v35, %v3153_v34  ;;  %v3896_v35 = vld [vmem:[#allocation4 + $0x3cc] sm:$0xf] }
  0xf6   :  { %2069 = vmatpush.bf16.msra.mxu2 %v2930_v53  ;;  %v4026_v53 = vld [vmem:[#allocation4 + $0x7d4] sm:$0xf0]  ;;  %v3490_v59 = vor.u32 %v3994_v49, %v3489_v48  ;;  %v3137_v45 = vld [vmem:[#allocation4 + $0x408] sm:$0xf]  ;;  %v3282_v46 = vor.u32 %v3942_v39, %v3281_v38  ;;  %v3792_v39 = vld [vmem:[#allocation4 + $0x8c] sm:$0xf] }
  0xf7   :  { %2082 = vmatpush.bf16.msra.mxu3 %v3058_v57  ;;  %v3922_v57 = vld [vmem:[#allocation4 + $0x494] sm:$0xf0]  ;;  %v3618_v62 = vor.u32 %v4026_v53, %v3617_v52  ;;  %v3265_v48 = vld [vmem:[#allocation4 + $0x508] sm:$0xf]  ;;  %v3804_v52 = vld [vmem:[#allocation4 + $0xec] sm:$0xf] }
  0xf8   :  { %2045 = vmatpush.bf16.msra.mxu0 %v2642_v61  ;;  %2058 = vmatpush.bf16.msra.mxu1 %v2770_v2  ;;  %v3954_v61 = vld [vmem:[#allocation4 + $0x594] sm:$0xf0]  ;;  %v3202_v2 = vor.u32 %v3922_v57, %v3201_v55  ;;  %v2739_v53 = vld [vmem:[#allocation4 + $0xf8] sm:$0xf0] }
  0xf9   :  { %v3330_v37 = vor.u32 %v3954_v61, %v3329_v60  ;;  %v3938_v49 = vld [vmem:[#allocation4 + $0x514] sm:$0xf0]  ;;  %v2867_v57 = vld [vmem:[#allocation4 + $0x1f8] sm:$0xf0] }
  0xfa   :  { %2070 = vmatpush.bf16.msra.mxu2 %v2914_v5  ;;  %v3185_v5 = vld [vmem:[#allocation4 + $0x468] sm:$0xf]  ;;  %v3974_v60 = vld [vmem:[#allocation4 + $0x634] sm:$0xf0]  ;;  %v3266_v1 = vor.u32 %v3938_v49, %v3265_v48  ;;  %v3892_v49 = vld [vmem:[#allocation4 + $0x3ac] sm:$0xf] }
  0xfb   :  { %2083 = vmatpush.bf16.msra.mxu3 %v3042_v9  ;;  %v3950_v9 = vld [vmem:[#allocation4 + $0x574] sm:$0xf0] }
  0xfc   :  { %2046 = vmatpush.bf16.msra.mxu0 %v2626_v13  ;;  %2059 = vmatpush.bf16.msra.mxu1 %v2754_v18  ;;  %v3186_v13 = vor.u32 %v3918_v6, %v3185_v5  ;;  %v3314_v18 = vor.u32 %v3950_v9, %v3313_v8  ;;  %v4006_v63 = vld [vmem:[#allocation4 + $0x734] sm:$0xf0]  ;;  %v2723_v5 = vld [vmem:[#allocation4 + $0xd8] sm:$0xf0]  ;;  %v3832_v6 = vld [vmem:[#allocation4 + $0x1cc] sm:$0xf] }
  0xfd   :  { %v3393_v9 = vld [vmem:[#allocation4 + $0x608] sm:$0xf]  ;;  %v2726_v17 = vor.u32 %v3800_v3, %v2723_v5 }
  0xfe   :  { %2071 = vmatpush.bf16.msra.mxu2 %v2898_v23  ;;  %v3297_v23 = vld [vmem:[#allocation4 + $0x548] sm:$0xf] }
  0xff   :  { %2084 = vmatpush.bf16.msra.mxu3 %v3026_v28  ;;  %2047 = vmatmul.bf16.vlgmr.msra.gmra.mxu0 %v4238_v51  ;;  %v3982_v28 = vld [vmem:[#allocation4 + $0x674] sm:$0xf0]  ;;  %v3298_v33 = vor.u32 %v3946_v24, %v3297_v23  ;;  %v3796_v23 = vld [vmem:[#allocation4 + $0xac] sm:$0xf]  ;;  %v2707_v24 = vld [vmem:[#allocation4 + $0xb8] sm:$0xf0] }
 0x100   :  { %2091 = vmatpush.bf16.msrb.mxu0 %v3250_v19  ;;  %2104 = vmatpush.bf16.msrb.mxu1 %v3378_v21  ;;  %v3169_v19 = vld [vmem:[#allocation4 + $0x448] sm:$0xf]  ;;  %v3458_v21 = vor.u32 %v3986_v12, %v3457_v11  ;;  %v4002_v12 = vld [vmem:[#allocation4 + $0x714] sm:$0xf0]  ;;  %v2710_v34 = vor.u32 %v3796_v23, %v2707_v24  ;;  %v3812_v23 = vld [vmem:[#allocation4 + $0x12c] sm:$0xf] }
 0x101   :  { %2060 = vmatmul.bf16.vlgmr.msra.gmra.mxu1 %v4241_v56  ;;  %v3170_v29 = vor.u32 %v3914_v20, %v3169_v19  ;;  %v3521_v11 = vld [vmem:[#allocation4 + $0x708] sm:$0xf]  ;;  %v3123_v19 = vld [vmem:[#allocation4 + $0x3f8] sm:$0xf0] }
 0x102   :  { %2072 = vmatpush.bf16.msra.mxu2 %v2882_v41  ;;  %v3425_v41 = vld [vmem:[#allocation4 + $0x648] sm:$0xf]  ;;  %v2771_v24 = vld [vmem:[#allocation4 + $0x138] sm:$0xf0] }
 0x103   :  { %2085 = vmatpush.bf16.msra.mxu3 %v3010_v43  ;;  %v3553_v43 = vld [vmem:[#allocation4 + $0x748] sm:$0xf] }
 0x104   :  { %2092 = vmatpush.bf16.msrb.mxu0 %v3234_v36  ;;  %2105 = vmatpush.bf16.msrb.mxu1 %v3362_v40  ;;  %v3442_v36 = vor.u32 %v3982_v28, %v3441_v26  ;;  %v3570_v40 = vor.u32 %v4014_v31, %v3569_v30  ;;  %v3828_v28 = vld [vmem:[#allocation4 + $0x1ac] sm:$0xf] }
 0x105   :  { %2073 = vmatmul.bf16.vlgmr.msra.gmra.mxu2 %v4246_v15  ;;  %v3864_v31 = vld [vmem:[#allocation4 + $0x2cc] sm:$0xf] }
 0x106   :  { %2117 = vmatpush.bf16.msrb.mxu2 %v3506_v44  ;;  %2086 = vmatmul.bf16.vlgmr.msra.gmra.mxu3 %v4248_v22  ;;  %v4010_v44 = vld [vmem:[#allocation4 + $0x754] sm:$0xf0] }
 0x107   :  { %2130 = vmatpush.bf16.msrb.mxu3 %v3634_v47  ;;  %v3906_v47 = vld [vmem:[#allocation4 + $0x414] sm:$0xf0]  ;;  %v3554_v55 = vor.u32 %v4010_v44, %v3553_v43 }
 0x108   :  { %2093 = vmatpush.bf16.msrb.mxu0 %v3218_v50  ;;  %2106 = vmatpush.bf16.msrb.mxu1 %v3346_v54  ;;  %v3426_v50 = vor.u32 %v3978_v16, %v3425_v41  ;;  %v3836_v54 = vld [vmem:[#allocation4 + $0x1ec] sm:$0xf]  ;;  %v3138_v61 = vor.u32 %v3906_v47, %v3137_v45 }
 0x109   :  { %v2870_v4 = vor.u32 %v3836_v54, %v2867_v57  ;;  %v3824_v16 = vld [vmem:[#allocation4 + $0x18c] sm:$0xf]  ;;  %v2675_v54 = vld [vmem:[#allocation4 + $0x78] sm:$0xf0] }
 0x10a   :  { %2118 = vmatpush.bf16.msrb.mxu2 %v3490_v59  ;;  %v3409_v59 = vld [vmem:[#allocation4 + $0x628] sm:$0xf]  ;;  %v3860_v45 = vld [vmem:[#allocation4 + $0x2ac] sm:$0xf] }
 0x10b   :  { %2131 = vmatpush.bf16.msrb.mxu3 %v3618_v62  ;;  %v3537_v62 = vld [vmem:[#allocation4 + $0x728] sm:$0xf]  ;;  %v3820_v57 = vld [vmem:[#allocation4 + $0x16c] sm:$0xf] }
 0x10c   :  { %2094 = vmatpush.bf16.msrb.mxu0 %v3202_v2  ;;  %2107 = vmatpush.bf16.msrb.mxu1 %v3330_v37  ;;  %v2742_v2 = vor.u32 %v3804_v52, %v2739_v53  ;;  %v3410_v37 = vor.u32 %v3974_v60, %v3409_v59  ;;  %v3538_v8 = vor.u32 %v4006_v63, %v3537_v62  ;;  %v3788_v53 = vld [vmem:[#allocation4 + $0x6c] sm:$0xf]  ;;  %v2803_v59 = vld [vmem:[#allocation4 + $0x178] sm:$0xf0] }
 0x10d   :  { %v2947_v62 = vld [vmem:[#allocation4 + $0x298] sm:$0xf0]  ;;  %v2678_v63 = vor.u32 %v3788_v53, %v2675_v54  ;;  %v2806_v3 = vor.u32 %v3820_v57, %v2803_v59  ;;  %v3876_v54 = vld [vmem:[#allocation4 + $0x32c] sm:$0xf] }
 0x10e   :  { %2119 = vmatpush.bf16.msrb.mxu2 %v3474_v7  ;;  %v2851_v7 = vld [vmem:[#allocation4 + $0x1d8] sm:$0xf0] }
 0x10f   :  { %2132 = vmatpush.bf16.msrb.mxu3 %v3602_v10  ;;  %v3970_v10 = vld [vmem:[#allocation4 + $0x614] sm:$0xf0]  ;;  %v2854_v20 = vor.u32 %v3832_v6, %v2851_v7  ;;  %v3816_v6 = vld [vmem:[#allocation4 + $0x14c] sm:$0xf]  ;;  %v2787_v7 = vld [vmem:[#allocation4 + $0x158] sm:$0xf0] }
 0x110   :  { %2095 = vmatpush.bf16.msrb.mxu0 %v3186_v13  ;;  %2108 = vmatpush.bf16.msrb.mxu1 %v3314_v18  ;;  %v3868_v13 = vld [vmem:[#allocation4 + $0x2ec] sm:$0xf] }
 0x111   :  { %v3900_v18 = vld [vmem:[#allocation4 + $0x3ec] sm:$0xf]  ;;  %v2998_v26 = vor.u32 %v3868_v13, %v2995_v14 }
 0x112   :  { %2120 = vmatpush.bf16.msrb.mxu2 %v3458_v21  ;;  %v3394_v21 = vor.u32 %v3970_v10, %v3393_v9  ;;  %v3126_v30 = vor.u32 %v3900_v18, %v3123_v19  ;;  %v3852_v10 = vld [vmem:[#allocation4 + $0x26c] sm:$0xf]  ;;  %v2790_v18 = vor.u32 %v3816_v6, %v2787_v7  ;;  %v3011_v7 = vld [vmem:[#allocation4 + $0x318] sm:$0xf0] }
 0x113   :  { %2133 = vmatpush.bf16.msrb.mxu3 %v3586_v25  ;;  %v3522_v25 = vor.u32 %v4002_v12, %v3521_v11  ;;  %v2931_v11 = vld [vmem:[#allocation4 + $0x278] sm:$0xf0]  ;;  %v3884_v14 = vld [vmem:[#allocation4 + $0x36c] sm:$0xf] }
 0x114   :  { %2096 = vmatpush.bf16.msrb.mxu0 %v3170_v29  ;;  %2109 = vmatpush.bf16.msrb.mxu1 %v3298_v33  ;;  %v2835_v29 = vld [vmem:[#allocation4 + $0x1b8] sm:$0xf0]  ;;  %v3780_v19 = vld [vmem:[#allocation4 + $0x2c] sm:$0xf] }
 0x115   :  { %v2979_v33 = vld [vmem:[#allocation4 + $0x2d8] sm:$0xf0]  ;;  %v2838_v38 = vor.u32 %v3828_v28, %v2835_v29 }
 0x116   :  { %2121 = vmatpush.bf16.msrb.mxu2 %v3442_v36  ;;  %v3107_v36 = vld [vmem:[#allocation4 + $0x3d8] sm:$0xf0]  ;;  %v2982_v41 = vor.u32 %v3864_v31, %v2979_v33  ;;  %v3880_v31 = vld [vmem:[#allocation4 + $0x34c] sm:$0xf] }
 0x117   :  { %2134 = vmatpush.bf16.msrb.mxu3 %v3570_v40  ;;  %v2691_v40 = vld [vmem:[#allocation4 + $0x98] sm:$0xf0]  ;;  %v3110_v44 = vor.u32 %v3896_v35, %v3107_v36  ;;  %v2774_v36 = vor.u32 %v3812_v23, %v2771_v24  ;;  %v3956_v24 = vld [vmem:[#allocation4 + $0x5ac] sm:$0xf] }
 0x118   :  { %2097 = vmatpush.bf16.msrb.mxu0 %v3154_v42  ;;  %2110 = vmatpush.bf16.msrb.mxu1 %v3282_v46  ;;  %v2819_v42 = vld [vmem:[#allocation4 + $0x198] sm:$0xf0]  ;;  %v2694_v48 = vor.u32 %v3792_v39, %v2691_v40  ;;  %v3808_v39 = vld [vmem:[#allocation4 + $0x10c] sm:$0xf] }
 0x119   :  { %v2963_v46 = vld [vmem:[#allocation4 + $0x2b8] sm:$0xf0]  ;;  %v2822_v52 = vor.u32 %v3824_v16, %v2819_v42  ;;  %v3932_v16 = vld [vmem:[#allocation4 + $0x4ec] sm:$0xf] }
 0x11a   :  { %2122 = vmatpush.bf16.msrb.mxu2 %v3426_v50  ;;  %v4281_v43 = vpop.f32.mrf.mxu0  ;;  %v3091_v50 = vld [vmem:[#allocation4 + $0x3b8] sm:$0xf0] }
 0x11b   :  { %2135 = vmatpush.bf16.msrb.mxu3 %v3554_v55  ;;  %v4284_v47 = vpop.f32.mrf.mxu1  ;;  %v2966_v55 = vor.u32 %v3860_v45, %v2963_v46  ;;  %v3094_v60 = vor.u32 %v3892_v49, %v3091_v50  ;;  %v2915_v28 = vld [vmem:[#allocation4 + $0x258] sm:$0xf0]  ;;  %v3844_v49 = vld [vmem:[#allocation4 + $0x22c] sm:$0xf] }
 0x11c   :  { %2098 = vmatpush.bf16.msrb.mxu0 %v3138_v61  ;;  %2111 = vmatpush.bf16.msrb.mxu1 %v3266_v1  ;;  %v3856_v61 = vld [vmem:[#allocation4 + $0x28c] sm:$0xf]  ;;  %v3043_v33 = vld [vmem:[#allocation4 + $0x358] sm:$0xf0] }
 0x11d   :  { %v3888_v1 = vld [vmem:[#allocation4 + $0x38c] sm:$0xf]  ;;  %v2950_v5 = vor.u32 %v3856_v61, %v2947_v62  ;;  %v2755_v40 = vld [vmem:[#allocation4 + $0x118] sm:$0xf0]  ;;  %v3046_v46 = vor.u32 %v3880_v31, %v3043_v33 }
 0x11e   :  { %2123 = vmatpush.bf16.msrb.mxu2 %v3410_v37  ;;  %v2659_v37 = vld [vmem:[#allocation4 + $0x58] sm:$0xf0]  ;;  %v2758_v57 = vor.u32 %v3808_v39, %v2755_v40  ;;  %v3920_v39 = vld [vmem:[#allocation4 + $0x48c] sm:$0xf] }
 0x11f   :  { %2136 = vmatpush.bf16.msrb.mxu3 %v3538_v8  ;;  %2099 = vmatmul.bf16.vlgmr.msrb.gmra.mxu0 %v4255_v58  ;;  %v3251_v42 = vld [vmem:[#allocation4 + $0x4f8] sm:$0xf0] }
 0x120   :  { %2143 = vmatpush.bf16.msra.mxu0 %v2742_v2  ;;  %2156 = vmatpush.bf16.msra.mxu1 %v2870_v4  ;;  %v3075_v2 = vld [vmem:[#allocation4 + $0x398] sm:$0xf0]  ;;  %v3784_v4 = vld [vmem:[#allocation4 + $0x4c] sm:$0xf]  ;;  %v3254_v59 = vor.u32 %v3932_v16, %v3251_v42 }
 0x121   :  { %2112 = vmatmul.bf16.vlgmr.msrb.gmra.mxu1 %v4257_v0  ;;  %v3078_v9 = vor.u32 %v3888_v1, %v3075_v2  ;;  %v2662_v13 = vor.u32 %v3784_v4, %v2659_v37  ;;  %v2899_v50 = vld [vmem:[#allocation4 + $0x238] sm:$0xf0]  ;;  %v3960_v1 = vld [vmem:[#allocation4 + $0x5cc] sm:$0xf] }
 0x122   :  { %2124 = vmatpush.bf16.msrb.mxu2 %v3394_v21  ;;  %v1842_v8 = vpop.f32.mrf.mxu0  ;;  %v2934_v21 = vor.u32 %v3852_v10, %v2931_v11  ;;  %v2902_v62 = vor.u32 %v3844_v49, %v2899_v50  ;;  %v3363_v2 = vld [vmem:[#allocation4 + $0x5d8] sm:$0xf0]  ;;  %v3840_v4 = vld [vmem:[#allocation4 + $0x20c] sm:$0xf] }
 0x123   :  { %2137 = vmatpush.bf16.msrb.mxu3 %v3522_v25  ;;  %v1855_v12 = vpop.f32.mrf.mxu1  ;;  %v2883_v37 = vld [vmem:[#allocation4 + $0x218] sm:$0xf0]  ;;  %v3996_v8 = vld [vmem:[#allocation4 + $0x6ec] sm:$0xf] }
 0x124   :  { %2144 = vmatpush.bf16.msra.mxu0 %v2726_v17  ;;  %2157 = vmatpush.bf16.msra.mxu1 %v2854_v20  ;;  %v3059_v17 = vld [vmem:[#allocation4 + $0x378] sm:$0xf0]  ;;  %v4028_v12 = vld [vmem:[#allocation4 + $0x7ec] sm:$0xf] }
 0x125   :  { %2125 = vmatmul.bf16.vlgmr.msrb.gmra.mxu2 %v4261_v27  ;;  %v2643_v20 = vld [vmem:[#allocation4 + $0x38] sm:$0xf0]  ;;  %v3062_v25 = vor.u32 %v3884_v14, %v3059_v17  ;;  %v3366_v14 = vor.u32 %v3960_v1, %v3363_v2  ;;  %v2886_v17 = vor.u32 %v3840_v4, %v2883_v37  ;;  %v4020_v50 = vld [vmem:[#allocation4 + $0x7ac] sm:$0xf] }
 0x126   :  { %2169 = vmatpush.bf16.msra.mxu2 %v2998_v26  ;;  %2138 = vmatmul.bf16.vlgmr.msrb.gmra.mxu3 %v4263_v32  ;;  %v3848_v26 = vld [vmem:[#allocation4 + $0x24c] sm:$0xf]  ;;  %v3491_v31 = vld [vmem:[#allocation4 + $0x6d8] sm:$0xf0] }
 0x127   :  { %2182 = vmatpush.bf16.msra.mxu3 %v3126_v30  ;;  %v2646_v30 = vor.u32 %v3780_v19, %v2643_v20  ;;  %v3219_v19 = vld [vmem:[#allocation4 + $0x4b8] sm:$0xf0]  ;;  %v3984_v1 = vld [vmem:[#allocation4 + $0x68c] sm:$0xf] }
 0x128   :  { %2145 = vmatpush.bf16.msra.mxu0 %v2710_v34  ;;  %2158 = vmatpush.bf16.msra.mxu1 %v2838_v38  ;;  %v4287_v29 = vpop.f32.mrf.mxu2  ;;  %v3776_v34 = vld [vmem:[#allocation4 + $0xc] sm:$0xf]  ;;  %v4289_v35 = vpop.f32.mrf.mxu3  ;;  %v2627_v38 = vld [vmem:[#allocation4 + $0x18] sm:$0xf0] }
 0x129   :  { %v2630_v53 = vor.u32 %v3776_v34, %v2627_v38  ;;  %v4024_v34 = vld [vmem:[#allocation4 + $0x7cc] sm:$0xf]  ;;  %v3331_v16 = vld [vmem:[#allocation4 + $0x598] sm:$0xf0] }
 0x12a   :  { %2170 = vmatpush.bf16.msra.mxu2 %v2982_v41  ;;  %v2918_v41 = vor.u32 %v3848_v26, %v2915_v28  ;;  %v4016_v4 = vld [vmem:[#allocation4 + $0x78c] sm:$0xf] }
 0x12b   :  { %2183 = vmatpush.bf16.msra.mxu3 %v3110_v44  ;;  %v3964_v44 = vld [vmem:[#allocation4 + $0x5ec] sm:$0xf]  ;;  %v4291_v45 = vpop.f32.mrf.mxu0 }
 0x12c   :  { %2146 = vmatpush.bf16.msra.mxu0 %v2694_v48  ;;  %2159 = vmatpush.bf16.msra.mxu1 %v2822_v52  ;;  %v3379_v48 = vld [vmem:[#allocation4 + $0x5f8] sm:$0xf0]  ;;  %v4293_v52 = vpop.f32.mrf.mxu1 }
 0x12d   :  { %v3382_v61 = vor.u32 %v3964_v44, %v3379_v48  ;;  %v3988_v44 = vld [vmem:[#allocation4 + $0x6ac] sm:$0xf] }
 0x12e   :  { %2171 = vmatpush.bf16.msra.mxu2 %v2966_v55  ;;  %v3027_v55 = vld [vmem:[#allocation4 + $0x338] sm:$0xf0] }
 0x12f   :  { %2184 = vmatpush.bf16.msra.mxu3 %v3094_v60  ;;  %v3928_v60 = vld [vmem:[#allocation4 + $0x4cc] sm:$0xf] }
 0x130   :  { %2147 = vmatpush.bf16.msra.mxu0 %v2678_v63  ;;  %2160 = vmatpush.bf16.msra.mxu1 %v2806_v3  ;;  %v3235_v63 = vld [vmem:[#allocation4 + $0x4d8] sm:$0xf0]  ;;  %v3030_v3 = vor.u32 %v3876_v54, %v3027_v55  ;;  %v1868_v6 = vpop.f32.mrf.mxu2  ;;  %v1881_v10 = vpop.f32.mrf.mxu3  ;;  %v3916_v55 = vld [vmem:[#allocation4 + $0x46c] sm:$0xf] }
 0x131   :  { %v3238_v11 = vor.u32 %v3928_v60, %v3235_v63  ;;  %v3948_v60 = vld [vmem:[#allocation4 + $0x56c] sm:$0xf]  ;;  %v3171_v6 = vld [vmem:[#allocation4 + $0x458] sm:$0xf0] }
 0x132   :  { %2172 = vmatpush.bf16.msra.mxu2 %v2950_v5  ;;  %v3872_v5 = vld [vmem:[#allocation4 + $0x30c] sm:$0xf] }
 0x133   :  { %2185 = vmatpush.bf16.msra.mxu3 %v3078_v9  ;;  %v3507_v9 = vld [vmem:[#allocation4 + $0x6f8] sm:$0xf0]  ;;  %v1894_v20 = vpop.f32.mrf.mxu0 }
 0x134   :  { %2148 = vmatpush.bf16.msra.mxu0 %v2662_v13  ;;  %2161 = vmatpush.bf16.msra.mxu1 %v2790_v18  ;;  %v3635_v13 = vld [vmem:[#allocation4 + $0x7f8] sm:$0xf0]  ;;  %v3924_v18 = vld [vmem:[#allocation4 + $0x4ac] sm:$0xf]  ;;  %v3510_v23 = vor.u32 %v3996_v8, %v3507_v9  ;;  %v1907_v26 = vpop.f32.mrf.mxu1  ;;  %v4310_v20 = vld [vmem:[%s4340_s4] sm:$0xf] }
 0x135   :  { %v3638_v28 = vor.u32 %v4028_v12, %v3635_v13  ;;  %v3222_v33 = vor.u32 %v3924_v18, %v3219_v19  ;;  %v3944_v8 = vld [vmem:[#allocation4 + $0x54c] sm:$0xf]  ;;  %v3299_v9 = vld [vmem:[#allocation4 + $0x558] sm:$0xf0] }
 0x136   :  { %2173 = vmatpush.bf16.msra.mxu2 %v2934_v21  ;;  %v3014_v21 = vor.u32 %v3872_v5, %v3011_v7  ;;  %v3912_v5 = vld [vmem:[#allocation4 + $0x44c] sm:$0xf]  ;;  %v3443_v13 = vld [vmem:[#allocation4 + $0x678] sm:$0xf0] }
 0x137   :  { %2186 = vmatpush.bf16.msra.mxu3 %v3062_v25  ;;  %v3347_v25 = vld [vmem:[#allocation4 + $0x5b8] sm:$0xf0]  ;;  %v3980_v12 = vld [vmem:[#allocation4 + $0x66c] sm:$0xf] }
 0x138   :  { %2149 = vmatpush.bf16.msra.mxu0 %v2646_v30  ;;  %2162 = vmatpush.bf16.msra.mxu1 %v2774_v36  ;;  %v3992_v30 = vld [vmem:[#allocation4 + $0x6cc] sm:$0xf]  ;;  %v3619_v36 = vld [vmem:[#allocation4 + $0x7d8] sm:$0xf0]  ;;  %v3350_v38 = vor.u32 %v3956_v24, %v3347_v25  ;;  %v4299_v48 = vpop.f32.mrf.mxu3  ;;  %v3446_v25 = vor.u32 %v3980_v12, %v3443_v13 }
 0x139   :  { %v3494_v40 = vor.u32 %v3992_v30, %v3491_v31  ;;  %v3622_v42 = vor.u32 %v4024_v34, %v3619_v36  ;;  %v4012_v18 = vld [vmem:[#allocation4 + $0x76c] sm:$0xf]  ;;  %v3571_v19 = vld [vmem:[#allocation4 + $0x778] sm:$0xf0]  ;;  %v543_v36 = vperm.slane %v4310_v20, 0 }
 0x13a   :  { %2174 = vmatpush.bf16.msra.mxu2 %v2918_v41  ;;  %v3952_v41 = vld [vmem:[#allocation4 + $0x58c] sm:$0xf]  ;;  %v3155_v24 = vld [vmem:[#allocation4 + $0x438] sm:$0xf0]  ;;  %v3574_v31 = vor.u32 %v4012_v18, %v3571_v19 }
 0x13b   :  { %2187 = vmatpush.bf16.msra.mxu3 %v3046_v46  ;;  %v3475_v46 = vld [vmem:[#allocation4 + $0x6b8] sm:$0xf0]  ;;  %v3334_v54 = vor.u32 %v3952_v41, %v3331_v16  ;;  %v3940_v26 = vld [vmem:[#allocation4 + $0x52c] sm:$0xf] }
 0x13c   :  { %2150 = vmatpush.bf16.msra.mxu0 %v2630_v53  ;;  %2163 = vmatpush.bf16.msra.mxu1 %v2758_v57  ;;  %v3603_v53 = vld [vmem:[#allocation4 + $0x7b8] sm:$0xf0]  ;;  %v3904_v16 = vld [vmem:[#allocation4 + $0x40c] sm:$0xf] }
 0x13d   :  { %v3187_v57 = vld [vmem:[#allocation4 + $0x478] sm:$0xf0]  ;;  %v3606_v63 = vor.u32 %v4020_v50, %v3603_v53  ;;  %v3972_v53 = vld [vmem:[#allocation4 + $0x62c] sm:$0xf] }
 0x13e   :  { %2175 = vmatpush.bf16.msra.mxu2 %v2902_v62  ;;  %v4303_v62 = vpop.f32.mrf.mxu0  ;;  %v4305_v2 = vpop.f32.mrf.mxu1  ;;  %v3427_v34 = vld [vmem:[#allocation4 + $0x658] sm:$0xf0]  ;;  %v4044_v18 = vld [vmem:[#allocation6 + $0x68] sm:$0xff] }
 0x13f   :  { %2188 = vmatpush.bf16.msra.mxu3 %v3030_v3  ;;  %2151 = vmatmul.bf16.vlgmr.msra.gmra.mxu0 %v4238_v51  ;;  %v3203_v51 = vld [vmem:[#allocation4 + $0x498] sm:$0xf0]  ;;  %v3190_v3 = vor.u32 %v3916_v55, %v3187_v57  ;;  %v1841_v55 = vadd.f32 %v4281_v43, %v543_v36  ;;  %v4000_v43 = vld [vmem:[#allocation4 + $0x70c] sm:$0xf] }
 0x140   :  { %2195 = vmatpush.bf16.msrb.mxu0 %v3254_v59  ;;  %2208 = vmatpush.bf16.msrb.mxu1 %v3382_v61  ;;  %v3206_v49 = vor.u32 %v3920_v39, %v3203_v51  ;;  %v3478_v59 = vor.u32 %v3988_v44, %v3475_v46  ;;  %v3315_v61 = vld [vmem:[#allocation4 + $0x578] sm:$0xf0]  ;;  %v4008_v51 = vld [vmem:[#allocation4 + $0x74c] sm:$0xf] }
 0x141   :  { %2164 = vmatmul.bf16.vlgmr.msra.gmra.mxu1 %v4241_v56  ;;  %v4297_v56 = vpop.f32.mrf.mxu2  ;;  %v3318_v37 = vor.u32 %v3948_v60, %v3315_v61  ;;  %v3936_v46 = vld [vmem:[#allocation4 + $0x50c] sm:$0xf] }
 0x142   :  { %2176 = vmatpush.bf16.msra.mxu2 %v2886_v17  ;;  %v3174_v17 = vor.u32 %v3912_v5, %v3171_v6  ;;  %v4004_v61 = vld [vmem:[#allocation4 + $0x72c] sm:$0xf]  ;;  %v3395_v5 = vld [vmem:[#allocation4 + $0x618] sm:$0xf0]  ;;  %v1854_v6 = vadd.f32 %v4284_v47, %v1841_v55 }
 0x143   :  { %2189 = vmatpush.bf16.msra.mxu3 %v3014_v21  ;;  %v3302_v21 = vor.u32 %v3944_v8, %v3299_v9  ;;  %v4037_v8 = vld [vmem:[#allocation6 + $0x30] sm:$0xff] }
 0x144   :  { %2196 = vmatpush.bf16.msrb.mxu0 %v3238_v11  ;;  %2209 = vmatpush.bf16.msrb.mxu1 %v3366_v14  ;;  %v1933_v14 = vpop.f32.mrf.mxu3  ;;  %v1867_v13 = vadd.f32 %v4287_v29, %v1854_v6 }
 0x145   :  { %2177 = vmatmul.bf16.vlgmr.msra.gmra.mxu2 %v4246_v15  ;;  %v3459_v15 = vld [vmem:[#allocation4 + $0x698] sm:$0xf0] }
 0x146   :  { %2221 = vmatpush.bf16.msrb.mxu2 %v3510_v23  ;;  %2190 = vmatmul.bf16.vlgmr.msra.gmra.mxu3 %v4248_v22  ;;  %v3587_v22 = vld [vmem:[#allocation4 + $0x798] sm:$0xf0]  ;;  %v3462_v7 = vor.u32 %v3984_v1, %v3459_v15  ;;  %v3908_v23 = vld [vmem:[#allocation4 + $0x42c] sm:$0xf]  ;;  %v1946_v30 = vpop.f32.mrf.mxu0 }
 0x147   :  { %2234 = vmatpush.bf16.msrb.mxu3 %v3638_v28  ;;  %v3590_v11 = vor.u32 %v4016_v4, %v3587_v22  ;;  %v3283_v28 = vld [vmem:[#allocation4 + $0x538] sm:$0xf0]  ;;  %v3158_v39 = vor.u32 %v3908_v23, %v3155_v24  ;;  %v4033_v30 = vld [vmem:[#allocation6 + $0x10] sm:$0xff] }
 0x148   :  { %2197 = vmatpush.bf16.msrb.mxu0 %v3222_v33  ;;  %2210 = vmatpush.bf16.msrb.mxu1 %v3350_v38  ;;  %v3976_v33 = vld [vmem:[#allocation4 + $0x64c] sm:$0xf]  ;;  %v1959_v38 = vpop.f32.mrf.mxu1  ;;  %v3286_v41 = vor.u32 %v3940_v26, %v3283_v28  ;;  %v4038_v15 = vld [vmem:[#allocation6 + $0x38] sm:$0xff] }
 0x149   :  { %v1920_v10 = vpop.f32.mrf.mxu2  ;;  %v3430_v44 = vor.u32 %v3976_v33, %v3427_v34  ;;  %v4046_v4 = vld [vmem:[#allocation6 + $0x78] sm:$0xff]  ;;  %v4040_v38 = vld [vmem:[#allocation6 + $0x48] sm:$0xff] }
 0x14a   :  { %2222 = vmatpush.bf16.msrb.mxu2 %v3494_v40  ;;  %v3555_v40 = vld [vmem:[#allocation4 + $0x758] sm:$0xf0]  ;;  %v4045_v10 = vld [vmem:[#allocation6 + $0x70] sm:$0xff] }
 0x14b   :  { %2235 = vmatpush.bf16.msrb.mxu3 %v3622_v42  ;;  %v3139_v42 = vld [vmem:[#allocation4 + $0x418] sm:$0xf0]  ;;  %v3558_v50 = vor.u32 %v4008_v51, %v3555_v40 }
 0x14c   :  { %2198 = vmatpush.bf16.msrb.mxu0 %v3206_v49  ;;  %2211 = vmatpush.bf16.msrb.mxu1 %v3334_v54  ;;  %v3267_v49 = vld [vmem:[#allocation4 + $0x518] sm:$0xf0]  ;;  %v3142_v60 = vor.u32 %v3904_v16, %v3139_v42  ;;  %v4031_v16 = vld [vmem:[#allocation6] sm:$0xff] }
 0x14d   :  { %v3411_v54 = vld [vmem:[#allocation4 + $0x638] sm:$0xf0]  ;;  %v3270_v1 = vor.u32 %v3936_v46, %v3267_v49 }
 0x14e   :  { %2223 = vmatpush.bf16.msrb.mxu2 %v3478_v59  ;;  %v1983_v59 = vpop.f32.mrf.mxu3  ;;  %v4042_v28 = vld [vmem:[#allocation6 + $0x58] sm:$0xff] }
 0x14f   :  { %2236 = vmatpush.bf16.msrb.mxu3 %v3606_v63  ;;  %v3539_v63 = vld [vmem:[#allocation4 + $0x738] sm:$0xf0] }
 0x150   :  { %2199 = vmatpush.bf16.msrb.mxu0 %v3190_v3  ;;  %2212 = vmatpush.bf16.msrb.mxu1 %v3318_v37  ;;  %v3414_v3 = vor.u32 %v3972_v53, %v3411_v54  ;;  %v3542_v22 = vor.u32 %v4004_v61, %v3539_v63  ;;  %v3968_v37 = vld [vmem:[#allocation4 + $0x60c] sm:$0xf]  ;;  %v4054_v40 = vld [vmem:[#allocation6 + $0xb8] sm:$0xff]  ;;  %v4049_v63 = vld [vmem:[#allocation6 + $0x90] sm:$0xff] }
 0x151   :  { %v1970_v57 = vpop.f32.mrf.mxu2  ;;  %v3398_v9 = vor.u32 %v3968_v37, %v3395_v5  ;;  %v4052_v54 = vld [vmem:[#allocation6 + $0xa8] sm:$0xff]  ;;  %v4047_v37 = vld [vmem:[#allocation6 + $0x80] sm:$0xff]  ;;  %v545_v5 = vperm.slane %v4310_v20, 2 }
 0x152   :  { %2224 = vmatpush.bf16.msrb.mxu2 %v3462_v7  ;;  %v3523_v7 = vld [vmem:[#allocation4 + $0x718] sm:$0xf0] }
 0x153   :  { %2237 = vmatpush.bf16.msrb.mxu3 %v3590_v11  ;;  %v544_v11 = vperm.slane %v4310_v20, 1  ;;  %v3526_v12 = vor.u32 %v4000_v43, %v3523_v7 }
 0x154   :  { %2200 = vmatpush.bf16.msrb.mxu0 %v3174_v17  ;;  %2213 = vmatpush.bf16.msrb.mxu1 %v3302_v21  ;;  %v4036_v17 = vld [vmem:[#allocation6 + $0x28] sm:$0xff]  ;;  %v1880_v21 = vadd.f32 %v4289_v35, %v1867_v13 }
 0x155   :  { %v1945_v19 = vadd.f32 %v4303_v62, %v544_v11  ;;  %v4034_v62 = vld [vmem:[#allocation6 + $0x18] sm:$0xff] }
 0x156   :  { %2225 = vmatpush.bf16.msrb.mxu2 %v3446_v25  ;;  %v1985_v14 = vpop.f32.mrf.mxu3  ;;  %v1893_v23 = vadd.f32 %v4291_v45, %v1880_v21  ;;  %v4032_v45 = vld [vmem:[#allocation6 + $0x8] sm:$0xff] }
 0x157   :  { %2238 = vmatpush.bf16.msrb.mxu3 %v3574_v31  ;;  %v1958_v29 = vadd.f32 %v4305_v2, %v1945_v19  ;;  %v4041_v31 = vld [vmem:[#allocation6 + $0x50] sm:$0xff]  ;;  %v4062_v19 = vld [vmem:[#allocation6 + $0xf8] sm:$0xff] }
 0x158   :  { %2201 = vmatpush.bf16.msrb.mxu0 %v3158_v39  ;;  %2214 = vmatpush.bf16.msrb.mxu1 %v3286_v41  ;;  %v1906_v35 = vadd.f32 %v4293_v52, %v1893_v23  ;;  %v4061_v23 = vld [vmem:[#allocation6 + $0xf0] sm:$0xff] }
 0x159   :  { %v1972_v47 = vpop.f32.mrf.mxu2  ;;  %v1971_v25 = vadd.f32 %v1970_v57, %v1958_v29  ;;  %v4051_v57 = vld [vmem:[#allocation6 + $0xa0] sm:$0xff] }
 0x15a   :  { %2226 = vmatpush.bf16.msrb.mxu2 %v3430_v44 }
 0x15b   :  { %2239 = vmatpush.bf16.msrb.mxu3 %v3558_v50  ;;  %v4053_v50 = vld [vmem:[#allocation6 + $0xb0] sm:$0xff] }
 0x15c   :  { %2202 = vmatpush.bf16.msrb.mxu0 %v3142_v60  ;;  %2215 = vmatpush.bf16.msrb.mxu1 %v3270_v1  ;;  %v1996_v24 = vpop.f32.mrf.mxu0  ;;  %v4050_v60 = vld [vmem:[#allocation6 + $0x98] sm:$0xff] }
 0x15e   :  { %2227 = vmatpush.bf16.msrb.mxu2 %v3414_v3  ;;  %v2009_v26 = vpop.f32.mrf.mxu1  ;;  %v4048_v3 = vld [vmem:[#allocation6 + $0x88] sm:$0xff] }
 0x15f   :  { %2240 = vmatpush.bf16.msrb.mxu3 %v3542_v22  ;;  %2203 = vmatmul.bf16.vlgmr.msrb.gmra.mxu0 %v4255_v58  ;;  %v4035_v58 = vld [vmem:[#allocation6 + $0x20] sm:$0xff] }
 0x160   :  { %2515 = vmatpush.bf16.msra.mxu0 %v4038_v15  ;;  %2528 = vmatpush.bf16.msra.mxu1 %v4046_v4 }
 0x161   :  { %2216 = vmatmul.bf16.vlgmr.msrb.gmra.mxu1 %v4257_v0  ;;  %v4043_v0 = vld [vmem:[#allocation6 + $0x60] sm:$0xff] }
 0x162   :  { %2228 = vmatpush.bf16.msrb.mxu2 %v3398_v9 }
 0x163   :  { %2241 = vmatpush.bf16.msrb.mxu3 %v3526_v12 }
 0x164   :  { %2516 = vmatpush.bf16.msra.mxu0 %v4037_v8  ;;  %2529 = vmatpush.bf16.msra.mxu1 %v4045_v10  ;;  %v1998_v2 = vpop.f32.mrf.mxu0 }
 0x165   :  { %2229 = vmatmul.bf16.vlgmr.msrb.gmra.mxu2 %v4261_v27  ;;  %v1984_v27 = vadd.f32 %v1983_v59, %v1971_v25  ;;  %v4056_v2 = vld [vmem:[#allocation6 + $0xc8] sm:$0xff] }
 0x166   :  { %2242 = vmatmul.bf16.vlgmr.msrb.gmra.mxu3 %v4263_v32  ;;  %v1919_v32 = vadd.f32 %v4297_v56, %v1906_v35  ;;  %v2011_v34 = vpop.f32.mrf.mxu1  ;;  %v4039_v56 = vld [vmem:[#allocation6 + $0x40] sm:$0xff]  ;;  %2541 = vmatpush.bf16.msra.mxu2 %v4054_v40 }
 0x167   :  { %v1997_v33 = vadd.f32 %v1996_v24, %v1984_v27  ;;  %2554 = vmatpush.bf16.msra.mxu3 %v4062_v19  ;;  %v4058_v27 = vld [vmem:[#allocation6 + $0xd8] sm:$0xff] }
 0x168   :  { %2517 = vmatpush.bf16.msra.mxu0 %v4036_v17  ;;  %2530 = vmatpush.bf16.msra.mxu1 %v4044_v18  ;;  %v1932_v36 = vadd.f32 %v4299_v48, %v1919_v32  ;;  %v2022_v51 = vpop.f32.mrf.mxu2  ;;  %v4057_v32 = vld [vmem:[#allocation6 + $0xd0] sm:$0xff] }
 0x169   :  { %v2010_v39 = vadd.f32 %v2009_v26, %v1997_v33  ;;  %v2035_v41 = vpop.f32.mrf.mxu3  ;;  %v4060_v26 = vld [vmem:[#allocation6 + $0xe8] sm:$0xff] }
 0x16a   :  { %v2247_v42 = vmax.f32 %v1932_v36, 0.0  ;;  %2542 = vmatpush.bf16.msra.mxu2 %v4053_v50  ;;  %v4055_v36 = vld [vmem:[#allocation6 + $0xc0] sm:$0xff] }
 0x16b   :  { %v2023_v52 = vadd.f32 %v2022_v51, %v2010_v39  ;;  %2555 = vmatpush.bf16.msra.mxu3 %v4061_v23 }
 0x16c   :  { %2518 = vmatpush.bf16.msra.mxu0 %v4035_v58  ;;  %2531 = vmatpush.bf16.msra.mxu1 %v4043_v0  ;;  %v2251_v49 = vpack.c.bf16 %v2247_v42, %v2247_v42 }
 0x16d   :  { %v2036_v44 = vadd.f32 %v2035_v41, %v2023_v52 }
 0x16e   :  { %2543 = vmatpush.bf16.msra.mxu2 %v4052_v54 }
 0x16f   :  { %v2248_v46 = vmax.f32 %v2036_v44, 0.0  ;;  %2556 = vmatpush.bf16.msra.mxu3 %v4060_v26 }
 0x170   :  { %2519 = vmatpush.bf16.msra.mxu0 %v4034_v62  ;;  %2532 = vmatpush.bf16.msra.mxu1 %v4042_v28  ;;  %v2024_v53 = vpop.f32.mrf.mxu2  ;;  %v4059_v28 = vld [vmem:[#allocation6 + $0xe0] sm:$0xff] }
 0x171   :  { %v2252_v48 = vpack.c.bf16 %v2248_v46, %v2248_v46  ;;  %v2037_v55 = vpop.f32.mrf.mxu3 }
 0x172   :  { %2544 = vmatpush.bf16.msra.mxu2 %v4051_v57 }
 0x173   :  { %2557 = vmatpush.bf16.msra.mxu3 %v4059_v28 }
 0x174   :  { %2520 = vmatpush.bf16.msra.mxu0 %v4033_v30  ;;  %2533 = vmatpush.bf16.msra.mxu1 %v4041_v31 }
 0x176   :  { %2545 = vmatpush.bf16.msra.mxu2 %v4050_v60 }
 0x177   :  { %2558 = vmatpush.bf16.msra.mxu3 %v4058_v27 }
 0x178   :  { %2521 = vmatpush.bf16.msra.mxu0 %v4032_v45  ;;  %2534 = vmatpush.bf16.msra.mxu1 %v4040_v38  ;;  %v546_v38 = vperm.slane %v4310_v20, 3 }
 0x17a   :  { %2546 = vmatpush.bf16.msra.mxu2 %v4049_v63 }
 0x17b   :  { %2559 = vmatpush.bf16.msra.mxu3 %v4057_v32 }
 0x17c   :  { %2522 = vmatpush.bf16.msra.mxu0 %v4031_v16  ;;  %2535 = vmatpush.bf16.msra.mxu1 %v4039_v56  ;;  %v2048_v59 = vpop.f32.mrf.mxu0 }
 0x17d   :  { %v2049_v7 = vadd.f32 %v2048_v59, %v545_v5 }
 0x17e   :  { %v2061_v61 = vpop.f32.mrf.mxu1  ;;  %2547 = vmatpush.bf16.msra.mxu2 %v4048_v3 }
 0x17f   :  { %2523 = vmatmul.bf16.vlgmr.msra.gmra.mxu0 %v2251_v49  ;;  %2536 = vmatmul.bf16.vlgmr.msra.gmra.mxu1 %v2252_v48  ;;  %v2062_v8 = vadd.f32 %v2061_v61, %v2049_v7  ;;  %v4073_v61 = vld [vmem:[%s4342_s6] ss:$0 sm:$0xff] }
 0x180   :  { %2560 = vmatpush.bf16.msra.mxu3 %v4056_v2 }
 0x182   :  { %2548 = vmatpush.bf16.msra.mxu2 %v4047_v37 }
 0x184   :  { %v2050_v1 = vpop.f32.mrf.mxu0  ;;  %2561 = vmatpush.bf16.msra.mxu3 %v4055_v36 }
 0x186   :  { %v2063_v15 = vpop.f32.mrf.mxu1 }
 0x188   :  { %v2074_v4 = vpop.f32.mrf.mxu2 }
 0x189   :  { %v2087_v22 = vpop.f32.mrf.mxu3  ;;  %v2075_v10 = vadd.f32 %v2074_v4, %v2062_v8 }
 0x18b   :  { %v2088_v12 = vadd.f32 %v2087_v22, %v2075_v10 }
 0x190   :  { %v2076_v6 = vpop.f32.mrf.mxu2 }
 0x191   :  { %v2089_v43 = vpop.f32.mrf.mxu3 }
 0x19c   :  { %v2100_v9 = vpop.f32.mrf.mxu0 }
 0x19d   :  { %v2101_v13 = vadd.f32 %v2100_v9, %v2088_v12 }
 0x19e   :  { %v2113_v11 = vpop.f32.mrf.mxu1 }
 0x19f   :  { %v2114_v17 = vadd.f32 %v2113_v11, %v2101_v13 }
 0x1a4   :  { %v2102_v47 = vpop.f32.mrf.mxu0 }
 0x1a6   :  { %v2115_v14 = vpop.f32.mrf.mxu1 }
 0x1a8   :  { %v2126_v18 = vpop.f32.mrf.mxu2 }
 0x1a9   :  { %v2127_v21 = vadd.f32 %v2126_v18, %v2114_v17  ;;  %v2139_v58 = vpop.f32.mrf.mxu3 }
 0x1ab   :  { %v2140_v0 = vadd.f32 %v2139_v58, %v2127_v21 }
 0x1ad   :  { %v2249_v29 = vmax.f32 %v2140_v0, 0.0 }
 0x1af   :  { %v2253_v24 = vpack.c.bf16 %v2249_v29, %v2249_v29 }
 0x1b0   :  { %v2128_v25 = vpop.f32.mrf.mxu2 }
 0x1b1   :  { %v2141_v62 = vpop.f32.mrf.mxu3  ;;  %2549 = vmatmul.bf16.vlgmr.msra.gmra.mxu2 %v2253_v24 }
 0x1bc   :  { %v2152_v35 = vpop.f32.mrf.mxu0 }
 0x1bd   :  { %v2153_v40 = vadd.f32 %v2152_v35, %v546_v38 }
 0x1be   :  { %v2165_v30 = vpop.f32.mrf.mxu1 }
 0x1bf   :  { %v2166_v52 = vadd.f32 %v2165_v30, %v2153_v40 }
 0x1c4   :  { %v2154_v31 = vpop.f32.mrf.mxu0 }
 0x1c6   :  { %v2167_v33 = vpop.f32.mrf.mxu1 }
 0x1c8   :  { %v2178_v34 = vpop.f32.mrf.mxu2 }
 0x1c9   :  { %v2191_v45 = vpop.f32.mrf.mxu3  ;;  %v2179_v16 = vadd.f32 %v2178_v34, %v2166_v52 }
 0x1cb   :  { %v2192_v56 = vadd.f32 %v2191_v45, %v2179_v16 }
 0x1d0   :  { %v2180_v39 = vpop.f32.mrf.mxu2 }
 0x1d1   :  { %v2193_v51 = vpop.f32.mrf.mxu3 }
 0x1dc   :  { %v2204_v41 = vpop.f32.mrf.mxu0 }
 0x1dd   :  { %v2205_v44 = vadd.f32 %v2204_v41, %v2192_v56 }
 0x1de   :  { %v2217_v42 = vpop.f32.mrf.mxu1 }
 0x1df   :  { %v2218_v50 = vadd.f32 %v2217_v42, %v2205_v44 }
 0x1e4   :  { %v2206_v46 = vpop.f32.mrf.mxu0 }
 0x1e6   :  { %v2219_v49 = vpop.f32.mrf.mxu1 }
 0x1e8   :  { %v2230_v48 = vpop.f32.mrf.mxu2 }
 0x1e9   :  { %v2231_v53 = vadd.f32 %v2230_v48, %v2218_v50  ;;  %v2243_v54 = vpop.f32.mrf.mxu3 }
 0x1eb   :  { %v2244_v55 = vadd.f32 %v2243_v54, %v2231_v53 }
 0x1ed   :  { %v2250_v57 = vmax.f32 %v2244_v55, 0.0 }
 0x1ef   :  { %v2254_v59 = vpack.c.bf16 %v2250_v57, %v2250_v57 }
 0x1f0   :  { %v2232_v60 = vpop.f32.mrf.mxu2 }
 0x1f1   :  { %v2245_v20 = vpop.f32.mrf.mxu3  ;;  %2562 = vmatmul.bf16.vlgmr.msra.gmra.mxu3 %v2254_v59 }
 0x1fc   :  { %v2524_v63 = vpop.f32.mrf.mxu0  ;;  %v2537_v15 = vpop.f32.mrf.mxu1 }
 0x1fd   :  { %v2525_v1 = vadd.f32 %v4073_v61, %v2524_v63 }
 0x1ff   :  { %v2538_v3 = vadd.f32 %v2537_v15, %v2525_v1 }
 0x204   :  { %v2526_v4 = vpop.f32.mrf.mxu0  ;;  %v2539_v22 = vpop.f32.mrf.mxu1 }
 0x234   :  { %v2550_v37 = vpop.f32.mrf.mxu2 }
 0x235   :  { %v2551_v6 = vadd.f32 %v2550_v37, %v2538_v3 }
 0x23c   :  { %v2552_v5 = vpop.f32.mrf.mxu2 }
 0x274   :  { %v2563_v43 = vpop.f32.mrf.mxu3 }
 0x275   :  { %v2564_v7 = vadd.f32 %v2563_v43, %v2551_v6 }
 0x277   :  { %v2567_v8 = vpack.c.bf16 %v2564_v7, %v2564_v7 }
 0x279   :  { %2568 = vst [vmem:[%s4343_s7] sm:$0xf] %v2567_v8 }
 0x27c   :  { %v2565_v9 = vpop.f32.mrf.mxu3 }
 0x27d   :  { %2573 = vsyncpa [#allocation3], 1 }
 0x27e   :  { %2574 = vsyncpa [#allocation5], 1 }

</bundles_post_ra>
